<compile_context>
chip_gen: v7x
topology: tpu7x:2x2x1
jax: 0.10.0
libtpu: 0.0.40
codegen_flags: <defaults>
</compile_context>

<pallas_src>
import numpy as np
import jax
import jax.numpy as jnp
from jax.experimental import pallas as pl
from jax.experimental.pallas import tpu as pltpu


def _round_up(n, m):
    return ((n + m - 1) // m) * m


def _choose_batch_tile(batch):
    # Small batches: one 8-sublane-aligned tile.  Large batches: TB=256 keeps
    # the MXU M-tiles full on v6e/v7x (2x256^2) and the per-step activation
    # buffers (~2.5 MiB f32+bf16, double-buffered) well inside every chip's
    # default scoped VMEM (16 MiB v5e, 32 MiB v6e/v7x).
    if batch <= 256:
        return _round_up(batch, 8)
    return 256


def mlp_kernel(x_ref, w1_ref, b1_ref, w2_ref, b2_ref, w3_ref, b3_ref, o_ref):
    # x_ref:  (TB, D_in)        bf16
    # wN_ref: (D_{n-1}, D_n)    bf16, (in, out) layout -> plain x @ W on MXU
    # bN_ref: (1, D_n)          f32
    # o_ref:  (TB, D_out)       f32, lane-dense
    x = x_ref[...]
    h = jnp.dot(x, w1_ref[...], preferred_element_type=jnp.float32)
    h = jnp.maximum(h + b1_ref[...], 0.0)
    h = jnp.dot(h.astype(jnp.bfloat16), w2_ref[...],
                preferred_element_type=jnp.float32)
    h = jnp.maximum(h + b2_ref[...], 0.0)
    h = jnp.dot(h.astype(jnp.bfloat16), w3_ref[...],
                preferred_element_type=jnp.float32)
    h = jnp.maximum(h + b3_ref[...], 0.0)
    o_ref[...] = h.astype(o_ref.dtype)


def mlp_alternative_forward(x, params, input_size, output_size, batch_tile=None):
    """Forward of MLPAlternative.

    x:      (B, *input_size) float32
    params: dict with (in, out)-layout weights (transpose of torch .weight):
        w1: (D_in,  fc1_N), b1: (fc1_N,)
        w2: (fc1_N, fc2_N), b2: (fc2_N,)
        w3: (fc2_N, D_out), b3: (D_out,)
    returns (B, *output_size) float32
    """
    B = x.shape[0]
    d_in = int(np.prod(input_size))
    d_out = int(np.prod(output_size))
    w1, b1 = params["w1"], params["b1"]
    w2, b2 = params["w2"], params["b2"]
    w3, b3 = params["w3"], params["b3"]
    fc1_n = w1.shape[1]
    fc2_n = w2.shape[1]

    # --- Wrapper-side prep: pad hidden dims to lane multiples, cast weights
    # to bf16 (f32 accumulation happens in-kernel), reshape biases to (1, N).
    fc1_p = _round_up(fc1_n, 128)   # 716 -> 768
    fc2_p = _round_up(fc2_n, 128)   # 102 -> 128
    w1p = jnp.pad(w1, ((0, 0), (0, fc1_p - fc1_n))).astype(jnp.bfloat16)
    b1p = jnp.pad(b1, (0, fc1_p - fc1_n)).reshape(1, fc1_p).astype(jnp.float32)
    w2p = jnp.pad(w2, ((0, fc1_p - fc1_n), (0, fc2_p - fc2_n))).astype(jnp.bfloat16)
    b2p = jnp.pad(b2, (0, fc2_p - fc2_n)).reshape(1, fc2_p).astype(jnp.float32)
    w3p = jnp.pad(w3, ((0, fc2_p - fc2_n), (0, 0))).astype(jnp.bfloat16)
    b3p = b3.reshape(1, d_out).astype(jnp.float32)

    # --- Batch tiling: pad B up to a multiple of the tile (>= 8 sublanes).
    tb = batch_tile if batch_tile is not None else _choose_batch_tile(B)
    b_pad = _round_up(B, tb)
    x2 = x.reshape(B, d_in).astype(jnp.bfloat16)   # row-major collapse, free
    if b_pad != B:
        x2 = jnp.pad(x2, ((0, b_pad - B), (0, 0)))

    grid = (pl.cdiv(b_pad, tb),)
    out2 = pl.pallas_call(
        mlp_kernel,
        out_shape=jax.ShapeDtypeStruct((b_pad, d_out), jnp.float32),
        grid=grid,
        in_specs=[
            # Activation stream: tiled along the batch axis.
            pl.BlockSpec((tb, d_in), lambda i: (i, 0)),
            # Weights / biases: constant index_map -> DMA'd once, VMEM-resident.
            pl.BlockSpec((d_in, fc1_p), lambda i: (0, 0)),
            pl.BlockSpec((1, fc1_p), lambda i: (0, 0)),
            pl.BlockSpec((fc1_p, fc2_p), lambda i: (0, 0)),
            pl.BlockSpec((1, fc2_p), lambda i: (0, 0)),
            pl.BlockSpec((fc2_p, d_out), lambda i: (0, 0)),
            pl.BlockSpec((1, d_out), lambda i: (0, 0)),
        ],
        out_specs=pl.BlockSpec((tb, d_out), lambda i: (i, 0)),
        compiler_params=pltpu.CompilerParams(
            dimension_semantics=("parallel",)),
    )(x2, w1p, b1p, w2p, b2p, w3p, b3p)

    out2 = out2[:B]
    return out2.reshape((B,) + tuple(output_size))


if __name__ == "__main__":
    key = jax.random.PRNGKey(0)
    keys = jax.random.split(key, 7)

    input_size = (4, 16, 16)    # input_dims  = 1024
    output_size = (3, 16, 16)   # output_dims = 768  (lane-dense: 6*128)
    B = 2

    d_in = int(np.prod(input_size))
    d_out = int(np.prod(output_size))
    fc1_n = int(0.7 * d_in)     # 716
    fc2_n = int(0.1 * d_in)     # 102

    def linear_params(kw, kb, fan_in, fan_out):
        bound = 1.0 / np.sqrt(fan_in)
        # (in, out) layout == transpose of torch.nn.Linear.weight
        w = jax.random.uniform(kw, (fan_in, fan_out), jnp.float32, -bound, bound)
        b = jax.random.uniform(kb, (fan_out,), jnp.float32, -bound, bound)
        return w, b

    w1, b1 = linear_params(keys[0], keys[1], d_in, fc1_n)
    w2, b2 = linear_params(keys[2], keys[3], fc1_n, fc2_n)
    w3, b3 = linear_params(keys[4], keys[5], fc2_n, d_out)
    x = jax.random.normal(keys[6], (B,) + input_size, jnp.float32)

    params = dict(w1=w1, b1=b1, w2=w2, b2=b2, w3=w3, b3=b3)
    out = mlp_alternative_forward(x, params, input_size, output_size)
    out = jax.block_until_ready(out)
    assert out.shape == (B,) + output_size

    # Reference (plain JAX, no Pallas, no padding) reproducing the same
    # mixed-precision flow: bf16 operands, f32 accumulation, f32 bias + ReLU.
    # Torch computes relu(x @ W.T + b) with W in (out, in) layout; weights here
    # are already (in, out), so it is x @ W + b.
    def ref_forward(xv):
        xb = xv.reshape(B, d_in).astype(jnp.bfloat16)
        h = jnp.dot(xb, w1.astype(jnp.bfloat16),
                    preferred_element_type=jnp.float32) + b1
        h = jnp.maximum(h, 0.0)
        h = jnp.dot(h.astype(jnp.bfloat16), w2.astype(jnp.bfloat16),
                    preferred_element_type=jnp.float32) + b2
        h = jnp.maximum(h, 0.0)
        h = jnp.dot(h.astype(jnp.bfloat16), w3.astype(jnp.bfloat16),
                    preferred_element_type=jnp.float32) + b3
        h = jnp.maximum(h, 0.0)
        return h.reshape((B,) + output_size)

    ref = jax.block_until_ready(ref_forward(x))
    np.testing.assert_allclose(np.asarray(out), np.asarray(ref),
                               rtol=1e-2, atol=1e-3)
    print("KERNEL_OK")
</pallas_src>

<mosaic_0001>
module attributes {stable_mosaic.version = 11 : i64} {
  func.func @mlp_kernel(%arg0: i32, %arg1: memref<8x1024xbf16, #tpu.memory_space<vmem>>, %arg2: memref<1024x768xbf16, #tpu.memory_space<vmem>>, %arg3: memref<1x768xf32, #tpu.memory_space<vmem>>, %arg4: memref<768x128xbf16, #tpu.memory_space<vmem>>, %arg5: memref<1x128xf32, #tpu.memory_space<vmem>>, %arg6: memref<128x768xbf16, #tpu.memory_space<vmem>>, %arg7: memref<1x768xf32, #tpu.memory_space<vmem>>, %arg8: memref<8x768xf32, #tpu.memory_space<vmem>>) attributes {dimension_semantics = [#tpu.dimension_semantics<parallel>], iteration_bounds = array<i64: 1>, scalar_prefetch = 0 : i64, scratch_operands = 0 : i64, tpu.core_type = #tpu.core_type<tc>, window_params = [{transform_indices = @transform_0, window_bounds = array<i64: 8, 1024>}, {pipeline_mode = #tpu.pipeline_mode<synchronous>, transform_indices = @transform_1, window_bounds = array<i64: 1024, 768>}, {pipeline_mode = #tpu.pipeline_mode<synchronous>, transform_indices = @transform_2, window_bounds = array<i64: 1, 768>}, {pipeline_mode = #tpu.pipeline_mode<synchronous>, transform_indices = @transform_3, window_bounds = array<i64: 768, 128>}, {pipeline_mode = #tpu.pipeline_mode<synchronous>, transform_indices = @transform_4, window_bounds = array<i64: 1, 128>}, {pipeline_mode = #tpu.pipeline_mode<synchronous>, transform_indices = @transform_5, window_bounds = array<i64: 128, 768>}, {pipeline_mode = #tpu.pipeline_mode<synchronous>, transform_indices = @transform_6, window_bounds = array<i64: 1, 768>}, {transform_indices = @transform_7, window_bounds = array<i64: 8, 768>}]} {
    %c0 = arith.constant 0 : index
    %c0_0 = arith.constant 0 : index
    %0 = vector.load %arg1[%c0, %c0_0] : memref<8x1024xbf16, #tpu.memory_space<vmem>>, vector<8x1024xbf16>
    %c0_1 = arith.constant 0 : index
    %c0_2 = arith.constant 0 : index
    %1 = vector.load %arg2[%c0_1, %c0_2] : memref<1024x768xbf16, #tpu.memory_space<vmem>>, vector<1024x768xbf16>
    %cst = arith.constant dense<0.000000e+00> : vector<8x768xf32>
    %2 = tpu.matmul %0, %1, %cst {dimension_numbers = #tpu.dot_dimension_numbers<[1], [0], [0], [1], [0, 0, 1, 1], [], []>} : vector<8x1024xbf16>, vector<1024x768xbf16>, vector<8x768xf32> -> vector<8x768xf32>
    %c0_3 = arith.constant 0 : index
    %c0_4 = arith.constant 0 : index
    %3 = vector.load %arg3[%c0_3, %c0_4] : memref<1x768xf32, #tpu.memory_space<vmem>>, vector<1x768xf32>
    %4 = vector.broadcast %3 : vector<1x768xf32> to vector<8x768xf32>
    %5 = arith.addf %2, %4 : vector<8x768xf32>
    %cst_5 = arith.constant 0.000000e+00 : f32
    %6 = vector.broadcast %cst_5 : f32 to vector<8x768xf32>
    %7 = arith.maximumf %5, %6 : vector<8x768xf32>
    %8 = arith.truncf %7 : vector<8x768xf32> to vector<8x768xbf16>
    %c0_6 = arith.constant 0 : index
    %c0_7 = arith.constant 0 : index
    %9 = vector.load %arg4[%c0_6, %c0_7] : memref<768x128xbf16, #tpu.memory_space<vmem>>, vector<768x128xbf16>
    %cst_8 = arith.constant dense<0.000000e+00> : vector<8x128xf32>
    %10 = tpu.matmul %8, %9, %cst_8 {dimension_numbers = #tpu.dot_dimension_numbers<[1], [0], [0], [1], [0, 0, 1, 1], [], []>} : vector<8x768xbf16>, vector<768x128xbf16>, vector<8x128xf32> -> vector<8x128xf32>
    %c0_9 = arith.constant 0 : index
    %c0_10 = arith.constant 0 : index
    %11 = vector.load %arg5[%c0_9, %c0_10] : memref<1x128xf32, #tpu.memory_space<vmem>>, vector<1x128xf32>
    %12 = vector.broadcast %11 : vector<1x128xf32> to vector<8x128xf32>
    %13 = arith.addf %10, %12 : vector<8x128xf32>
    %cst_11 = arith.constant 0.000000e+00 : f32
    %14 = vector.broadcast %cst_11 : f32 to vector<8x128xf32>
    %15 = arith.maximumf %13, %14 : vector<8x128xf32>
    %16 = arith.truncf %15 : vector<8x128xf32> to vector<8x128xbf16>
    %c0_12 = arith.constant 0 : index
    %c0_13 = arith.constant 0 : index
    %17 = vector.load %arg6[%c0_12, %c0_13] : memref<128x768xbf16, #tpu.memory_space<vmem>>, vector<128x768xbf16>
    %cst_14 = arith.constant dense<0.000000e+00> : vector<8x768xf32>
    %18 = tpu.matmul %16, %17, %cst_14 {dimension_numbers = #tpu.dot_dimension_numbers<[1], [0], [0], [1], [0, 0, 1, 1], [], []>} : vector<8x128xbf16>, vector<128x768xbf16>, vector<8x768xf32> -> vector<8x768xf32>
    %c0_15 = arith.constant 0 : index
    %c0_16 = arith.constant 0 : index
    %19 = vector.load %arg7[%c0_15, %c0_16] : memref<1x768xf32, #tpu.memory_space<vmem>>, vector<1x768xf32>
    %20 = vector.broadcast %19 : vector<1x768xf32> to vector<8x768xf32>
    %21 = arith.addf %18, %20 : vector<8x768xf32>
    %cst_17 = arith.constant 0.000000e+00 : f32
    %22 = vector.broadcast %cst_17 : f32 to vector<8x768xf32>
    %23 = arith.maximumf %21, %22 : vector<8x768xf32>
    %c0_18 = arith.constant 0 : index
    %c0_19 = arith.constant 0 : index
    %24 = vector.load %arg8[%c0_18, %c0_19] : memref<8x768xf32, #tpu.memory_space<vmem>>, vector<8x768xf32>
    tpu.vector_store %arg8[%c0_18, %c0_19], %23 {strides = array<i32>} : memref<8x768xf32, #tpu.memory_space<vmem>>, vector<8x768xf32>,
    return
  }
  func.func @transform_0(%arg0: i32) -> (i32, i32) {
    %c0_i32 = arith.constant 0 : i32
    %c0_i32_0 = arith.constant 0 : i32
    return %arg0, %c0_i32 : i32, i32
  }
  func.func @transform_1(%arg0: i32) -> (i32, i32) {
    %c0_i32 = arith.constant 0 : i32
    %c0_i32_0 = arith.constant 0 : i32
    %c0_i32_1 = arith.constant 0 : i32
    return %c0_i32, %c0_i32_0 : i32, i32
  }
  func.func @transform_2(%arg0: i32) -> (i32, i32) {
    %c0_i32 = arith.constant 0 : i32
    %c0_i32_0 = arith.constant 0 : i32
    %c0_i32_1 = arith.constant 0 : i32
    return %c0_i32, %c0_i32_0 : i32, i32
  }
  func.func @transform_3(%arg0: i32) -> (i32, i32) {
    %c0_i32 = arith.constant 0 : i32
    %c0_i32_0 = arith.constant 0 : i32
    %c0_i32_1 = arith.constant 0 : i32
    return %c0_i32, %c0_i32_0 : i32, i32
  }
  func.func @transform_4(%arg0: i32) -> (i32, i32) {
    %c0_i32 = arith.constant 0 : i32
    %c0_i32_0 = arith.constant 0 : i32
    %c0_i32_1 = arith.constant 0 : i32
    return %c0_i32, %c0_i32_0 : i32, i32
  }
  func.func @transform_5(%arg0: i32) -> (i32, i32) {
    %c0_i32 = arith.constant 0 : i32
    %c0_i32_0 = arith.constant 0 : i32
    %c0_i32_1 = arith.constant 0 : i32
    return %c0_i32, %c0_i32_0 : i32, i32
  }
  func.func @transform_6(%arg0: i32) -> (i32, i32) {
    %c0_i32 = arith.constant 0 : i32
    %c0_i32_0 = arith.constant 0 : i32
    %c0_i32_1 = arith.constant 0 : i32
    return %c0_i32, %c0_i32_0 : i32, i32
  }
  func.func @transform_7(%arg0: i32) -> (i32, i32) {
    %c0_i32 = arith.constant 0 : i32
    %c0_i32_0 = arith.constant 0 : i32
    return %arg0, %c0_i32 : i32, i32
  }
}

</mosaic_0001>

<bundles_post_ra>
// kernel: tpu_custom_call.1
= control target key start
LH: loop header
LB: loop body
LE: loop exit
PB: predicated region body
PF: predicated region fallthrough
CT: control target
= control target key end

     0   :  { %12 = vsyncpa [#allocation3], 0  ;;  %s5731_s0 = inlined_call_operand.hbm [shape: bf16[8,1024], index: 0, kind: input, shape index: {}]   ;;  %s5732_s1 = inlined_call_operand.hbm [shape: bf16[1024,768], index: 1, kind: input, shape index: {}]   ;;  %s5733_s2 = inlined_call_operand.hbm [shape: f32[1,768], index: 2, kind: input, shape index: {}]   ;;  %s5734_s3 = inlined_call_operand.hbm [shape: bf16[768,128], index: 3, kind: input, shape index: {}]   ;;  %s5735_s4 = inlined_call_operand.hbm [shape: f32[1,128], index: 4, kind: input, shape index: {}]   ;;  %s5736_s5 = inlined_call_operand.hbm [shape: bf16[128,768], index: 5, kind: input, shape index: {}]   ;;  %s5737_s6 = inlined_call_operand.hbm [shape: f32[1,768], index: 6, kind: input, shape index: {}]   ;;  %s5738_s7 = inlined_call_operand.hbm [shape: f32[8,768], index: 7, kind: output, shape index: {}]  }
   0x1   :  { %13 = vsyncpa [#allocation6], 0 }
   0x2   :  { %14 = vsyncpa [#allocation9], 0 }
   0x3   :  { %15 = vsyncpa [#allocation12], 0 }
   0x4   :  { %16 = vsyncpa [#allocation4], 0  ;;  %s5473_s24 = smov [#allocation5]   ;;  %s5287_s28 = scalar_lea.hbm %s5732_s1, 49152 }
   0x5   :  { %s32_s25 = sshll.u32 %s5473_s24, 4  ;;  %p5288_p0 = scmp.ne.s32.totalorder %s5732_s1, %s5287_s28  ;;  %s33_s25 = int_to_ptr.vmem [resolvable:$true] %s32_s25 }
   0x6   :  { %p5291_p1 = scmp.lt.u32.totalorder %s5287_s28, %s5732_s1 }
   0x8   :  { %p5293_p2 = pnand %p5291_p1, %p5288_p0 }
   0xa   :  { %5296 = shalt.err (!%p5293_p2)
}
   0xb   :  { %s5297_s10 = scalar_lea.vmem %s33_s25, 49152  ;;  %p5302_p4 = scmp.lt.s32.totalorder %s33_s25, %s33_s25 }
   0xc   :  { %p5298_p3 = scmp.ne.s32.totalorder %s33_s25, %s5297_s10  ;;  %p5303_p5 = scmp.lt.s32.totalorder %s5297_s10, %s5297_s10 }
   0xe   :  { %p5304_p6 = por %p5303_p5, %p5302_p4 }
  0x10   :  { %p5305_p7 = pnand %p5304_p6, %p5298_p3 }
  0x12   :  { %5308 = shalt.err (!%p5305_p7)
}
  0x13   :  { %s5474_s11 = smov 384   ;;  %s5475_s12 = smov 24  }
  0x14   :  { %38 = dma.hbm_to_vmem [thread:$0]  %s5732_s1, 49152, %s33_s25, [#allocation6], %s5474_s11, %s5474_s11, %s5475_s12  }
  0x15   :  { %s5476_s15 = smov [#allocation8]   ;;  %s5309_s19 = scalar_lea.hbm %s5734_s3, 6144 }
  0x16   :  { %s54_s16 = sshll.u32 %s5476_s15, 4  ;;  %p5310_p8 = scmp.ne.s32.totalorder %s5734_s3, %s5309_s19  ;;  %s55_s16 = int_to_ptr.vmem [resolvable:$true] %s54_s16 }
  0x17   :  { %p5313_p9 = scmp.lt.u32.totalorder %s5309_s19, %s5734_s3 }
  0x19   :  { %p5315_p10 = pnand %p5313_p9, %p5310_p8 }
  0x1b   :  { %5318 = shalt.err (!%p5315_p10)
}
  0x1c   :  { %s5319_s24 = scalar_lea.vmem %s55_s16, 6144  ;;  %p5324_p12 = scmp.lt.s32.totalorder %s55_s16, %s55_s16 }
  0x1d   :  { %p5320_p11 = scmp.ne.s32.totalorder %s55_s16, %s5319_s24  ;;  %p5325_p13 = scmp.lt.s32.totalorder %s5319_s24, %s5319_s24 }
  0x1f   :  { %p5326_p0 = por %p5325_p13, %p5324_p12 }
  0x21   :  { %p5327_p1 = pnand %p5326_p0, %p5320_p11 }
  0x23   :  { %5330 = shalt.err (!%p5327_p1)
}
  0x24   :  { %s5477_s1 = smov 64   ;;  %s5478_s25 = smov 4  }
  0x25   :  { %60 = dma.hbm_to_vmem [thread:$0]  %s5734_s3, 6144, %s55_s16, [#allocation9], %s5477_s1, %s5477_s1, %s5478_s25  }
  0x26   :  { %s5479_s28 = smov [#allocation11]   ;;  %s5480_s30 = smov [#allocation2]  }
  0x27   :  { %s76_s29 = sshll.u32 %s5479_s28, 4  ;;  %s23_s8 = sshll.u32 %s5480_s30, 4  ;;  %s77_s29 = int_to_ptr.vmem [resolvable:$true] %s76_s29  ;;  %s24_s8 = int_to_ptr.vmem [resolvable:$true] %s23_s8 }
  0x28   :  { %s5331_s13 = scalar_lea.hbm %s5736_s5, 6144 }
  0x29   :  { %p5332_p2 = scmp.ne.s32.totalorder %s5736_s5, %s5331_s13  ;;  %p5335_p3 = scmp.lt.u32.totalorder %s5331_s13, %s5736_s5 }
  0x2b   :  { %p5337_p4 = pnand %p5335_p3, %p5332_p2 }
  0x2d   :  { %5340 = shalt.err (!%p5337_p4)
}
  0x2e   :  { %s5341_s3 = scalar_lea.vmem %s77_s29, 6144  ;;  %p5346_p6 = scmp.lt.s32.totalorder %s77_s29, %s77_s29 }
  0x2f   :  { %p5342_p5 = scmp.ne.s32.totalorder %s77_s29, %s5341_s3  ;;  %p5347_p7 = scmp.lt.s32.totalorder %s5341_s3, %s5341_s3 }
  0x31   :  { %p5348_p8 = por %p5347_p7, %p5346_p6 }
  0x33   :  { %p5349_p9 = pnand %p5348_p8, %p5342_p5 }
  0x35   :  { %5352 = shalt.err (!%p5349_p9)
}
  0x36   :  { %82 = dma.hbm_to_vmem [thread:$0]  %s5736_s5, 6144, %s77_s29, [#allocation12], %s5474_s11, %s5474_s11, %s5475_s12  }
  0x37   :  { %s5353_s22 = scalar_lea.hbm %s5731_s0, 512 }
  0x38   :  { %p5354_p10 = scmp.ne.s32.totalorder %s5731_s0, %s5353_s22  ;;  %p5357_p11 = scmp.lt.u32.totalorder %s5353_s22, %s5731_s0 }
  0x3a   :  { %p5359_p12 = pnand %p5357_p11, %p5354_p10 }
  0x3c   :  { %5362 = shalt.err (!%p5359_p12)
}
  0x3d   :  { %s5363_s26 = scalar_lea.vmem %s24_s8, 512  ;;  %p5368_p0 = scmp.lt.s32.totalorder %s24_s8, %s24_s8 }
  0x3e   :  { %p5364_p13 = scmp.ne.s32.totalorder %s24_s8, %s5363_s26  ;;  %p5369_p1 = scmp.lt.s32.totalorder %s5363_s26, %s5363_s26 }
  0x40   :  { %p5370_p2 = por %p5369_p1, %p5368_p0 }
  0x42   :  { %p5371_p3 = pnand %p5370_p2, %p5364_p13 }
  0x44   :  { %5374 = shalt.err (!%p5371_p3)
}
  0x45   :  { %26 = dma.hbm_to_vmem [thread:$0]  %s5731_s0, 512, %s24_s8, [#allocation3]  }
  0x46   :  { %s5481_s12 = smov [#allocation7]   ;;  %s5482_s28 = smov [#allocation10]  }
  0x47   :  { %s45_s27 = sshll.u32 %s5481_s12, 4  ;;  %s67_s29 = sshll.u32 %s5482_s28, 4  ;;  %s46_s27 = int_to_ptr.vmem [resolvable:$true] %s45_s27  ;;  %s68_s29 = int_to_ptr.vmem [resolvable:$true] %s67_s29 }
  0x48   :  { %s5375_s10 = scalar_lea.hbm %s5733_s2, 96 }
  0x49   :  { %p5376_p4 = scmp.ne.s32.totalorder %s5733_s2, %s5375_s10  ;;  %p5379_p5 = scmp.lt.u32.totalorder %s5375_s10, %s5733_s2 }
  0x4b   :  { %p5381_p6 = pnand %p5379_p5, %p5376_p4 }
  0x4d   :  { %5384 = shalt.err (!%p5381_p6)
}
  0x4e   :  { %s5385_s0 = scalar_lea.vmem %s46_s27, 96  ;;  %p5390_p8 = scmp.lt.s32.totalorder %s46_s27, %s46_s27 }
  0x4f   :  { %p5386_p7 = scmp.ne.s32.totalorder %s46_s27, %s5385_s0  ;;  %p5391_p9 = scmp.lt.s32.totalorder %s5385_s0, %s5385_s0 }
  0x51   :  { %p5392_p10 = por %p5391_p9, %p5390_p8 }
  0x53   :  { %p5393_p11 = pnand %p5392_p10, %p5386_p7 }
  0x55   :  { %5396 = shalt.err (!%p5393_p11)
}
  0x56   :  { %48 = dma.hbm_to_vmem [thread:$0]  %s5733_s2, 96, %s46_s27, [#allocation6]  }
  0x57   :  { %s5397_s19 = scalar_lea.hbm %s5735_s4, 16 }
  0x58   :  { %p5398_p12 = scmp.ne.s32.totalorder %s5735_s4, %s5397_s19  ;;  %p5401_p13 = scmp.lt.u32.totalorder %s5397_s19, %s5735_s4 }
  0x5a   :  { %p5403_p0 = pnand %p5401_p13, %p5398_p12 }
  0x5c   :  { %5406 = shalt.err (!%p5403_p0)
}
  0x5d   :  { %s5407_s24 = scalar_lea.vmem %s68_s29, 16  ;;  %s5411_s1 = scalar_lea.vmem %s68_s29, 32 }
  0x5e   :  { %p5408_p1 = scmp.ne.s32.totalorder %s68_s29, %s5407_s24  ;;  %p5412_p2 = scmp.lt.s32.totalorder %s68_s29, %s68_s29 }
  0x5f   :  { %p5413_p3 = scmp.lt.s32.totalorder %s5411_s1, %s5407_s24 }
  0x61   :  { %p5414_p4 = por %p5413_p3, %p5412_p2 }
  0x63   :  { %p5415_p5 = pnand %p5414_p4, %p5408_p1 }
  0x65   :  { %5418 = shalt.err (!%p5415_p5)
}
  0x66   :  { %70 = dma.hbm_to_vmem [thread:$0]  %s5735_s4, 16, %s68_s29, [#allocation9]  }
  0x67   :  { %s5483_s26 = smov [#allocation13]   ;;  %s5419_s27 = scalar_lea.hbm %s5737_s6, 96 }
  0x68   :  { %s89_s5 = sshll.u32 %s5483_s26, 4  ;;  %p5420_p6 = scmp.ne.s32.totalorder %s5737_s6, %s5419_s27  ;;  %s90_s5 = int_to_ptr.vmem [resolvable:$true] %s89_s5 }
  0x69   :  { %p5423_p7 = scmp.lt.u32.totalorder %s5419_s27, %s5737_s6 }
  0x6b   :  { %p5425_p8 = pnand %p5423_p7, %p5420_p6 }
  0x6d   :  { %5428 = shalt.err (!%p5425_p8)
}
  0x6e   :  { %s5429_s13 = scalar_lea.vmem %s90_s5, 96  ;;  %p5434_p10 = scmp.lt.s32.totalorder %s90_s5, %s90_s5 }
  0x6f   :  { %p5430_p9 = scmp.ne.s32.totalorder %s90_s5, %s5429_s13  ;;  %p5435_p11 = scmp.lt.s32.totalorder %s5429_s13, %s5429_s13 }
  0x71   :  { %p5436_p12 = por %p5435_p11, %p5434_p10 }
  0x73   :  { %p5437_p13 = pnand %p5436_p12, %p5430_p9 }
  0x75   :  { %5440 = shalt.err (!%p5437_p13)
}
  0x76   :  { %92 = dma.hbm_to_vmem [thread:$0]  %s5737_s6, 96, %s90_s5, [#allocation12]  }
  0x77   :  { %5463 = dma.done.wait [#allocation3], 512  }
  0x78   :  { %5464 = vsyncadd [#allocation3], 4294966784 }
  0x79   :  { %5465 = dma.done.wait [#allocation6], 49248  }
  0x7a   :  { %5466 = vsyncadd [#allocation6], 4294918048 }
  0x7b   :  { %5467 = dma.done.wait [#allocation9], 6160  }
  0x7c   :  { %5468 = vsyncadd [#allocation9], 4294961136 }
  0x7d   :  { %5469 = dma.done.wait [#allocation12], 6240  }
  0x7e   :  { %5470 = vsyncadd [#allocation12], 4294961056  ;;  %v4583_v0 = vld [vmem:[#allocation5 + $0x4] ss:$24 sps:$4 sm:$0xff]   ;;  %v4585_v1 = vld [vmem:[#allocation5] ss:$24 sps:$4 sm:$0xff]  }
  0x7f   :  { %2483 = vmatprep.subr.bf16.mxu0 %v4583_v0  ;;  %v4586_v2 = vld [vmem:[#allocation5 + $0x34] ss:$24 sps:$4 sm:$0xff]   ;;  %v4588_v3 = vld [vmem:[#allocation5 + $0x30] ss:$24 sps:$4 sm:$0xff]   ;;  %v4589_v4 = vld [vmem:[#allocation5 + $0x64] ss:$24 sps:$4 sm:$0xff]  }
  0x80   :  { %2484 = vmatpush1.bf16.msra.mxu0 %v4585_v1  ;;  %v4591_v5 = vld [vmem:[#allocation5 + $0x60] ss:$24 sps:$4 sm:$0xff]   ;;  %v4592_v6 = vld [vmem:[#allocation5 + $0x94] ss:$24 sps:$4 sm:$0xff]   ;;  %v4594_v7 = vld [vmem:[#allocation5 + $0x90] ss:$24 sps:$4 sm:$0xff]  }
  0x81   :  { %2485 = vmatprep.subr.bf16.mxu0 %v4586_v2  ;;  %v4607_v8 = vld [vmem:[#allocation5 + $0xc] ss:$24 sps:$4 sm:$0xff]   ;;  %v4611_v10 = vld [vmem:[#allocation5 + $0x8] ss:$24 sps:$4 sm:$0xff]   ;;  %v4613_v11 = vld [vmem:[#allocation5 + $0x3c] ss:$24 sps:$4 sm:$0xff]  }
  0x82   :  { %v4595_v9 = vld [vmem:[#allocation5 + $0xc4] ss:$24 sps:$4 sm:$0xff]   ;;  %2647 = vmatprep.subr.bf16.mxu1 %v4607_v8  ;;  %v4597_v12 = vld [vmem:[#allocation5 + $0xc0] ss:$24 sps:$4 sm:$0xff]   ;;  %v4598_v13 = vld [vmem:[#allocation5 + $0xf4] ss:$24 sps:$4 sm:$0xff]  }
  0x83   :  { %2648 = vmatpush1.bf16.msra.mxu1 %v4611_v10  ;;  %v4617_v14 = vld [vmem:[#allocation5 + $0x38] ss:$24 sps:$4 sm:$0xff]   ;;  %v4619_v15 = vld [vmem:[#allocation5 + $0x6c] ss:$24 sps:$4 sm:$0xff]   ;;  %v4623_v17 = vld [vmem:[#allocation5 + $0x68] ss:$24 sps:$4 sm:$0xff]  }
  0x84   :  { %2486 = vmatpush1.bf16.msra.mxu0 %v4588_v3  ;;  %2649 = vmatprep.subr.bf16.mxu1 %v4613_v11  ;;  %v4600_v16 = vld [vmem:[#allocation5 + $0xf0] ss:$24 sps:$4 sm:$0xff]   ;;  %v4625_v18 = vld [vmem:[#allocation5 + $0x9c] ss:$24 sps:$4 sm:$0xff]   ;;  %v4603_v21 = vld [vmem:[#allocation5 + $0x120] ss:$24 sps:$4 sm:$0xff]  }
  0x85   :  { %2487 = vmatprep.subr.bf16.mxu0 %v4589_v4  ;;  %v4601_v19 = vld [vmem:[#allocation5 + $0x124] ss:$24 sps:$4 sm:$0xff]   ;;  %v4629_v20 = vld [vmem:[#allocation5 + $0x98] ss:$24 sps:$4 sm:$0xff]   ;;  %v4604_v23 = vld [vmem:[#allocation5 + $0x154] ss:$24 sps:$4 sm:$0xff]  }
  0x86   :  { %v4631_v22 = vld [vmem:[#allocation5 + $0xcc] ss:$24 sps:$4 sm:$0xff]   ;;  %v4606_v24 = vld [vmem:[#allocation5 + $0x150] ss:$24 sps:$4 sm:$0xff]   ;;  %v4637_v26 = vld [vmem:[#allocation5 + $0xfc] ss:$24 sps:$4 sm:$0xff]  }
  0x87   :  { %2650 = vmatpush1.bf16.msra.mxu1 %v4617_v14  ;;  %v4635_v25 = vld [vmem:[#allocation5 + $0xc8] ss:$24 sps:$4 sm:$0xff]   ;;  %v4609_v27 = vld [vmem:[#allocation5 + $0x184] ss:$24 sps:$4 sm:$0xff]   ;;  %v4641_v28 = vld [vmem:[#allocation5 + $0xf8] ss:$24 sps:$4 sm:$0xff]  }
  0x88   :  { %2488 = vmatpush1.bf16.msra.mxu0 %v4591_v5  ;;  %2651 = vmatprep.subr.bf16.mxu1 %v4619_v15  ;;  %v4612_v29 = vld [vmem:[#allocation5 + $0x180] ss:$24 sps:$4 sm:$0xff]   ;;  %v4643_v30 = vld [vmem:[#allocation5 + $0x12c] ss:$24 sps:$4 sm:$0xff]   ;;  %v4618_v33 = vld [vmem:[#allocation5 + $0x1b0] ss:$24 sps:$4 sm:$0xff]  }
  0x89   :  { %2489 = vmatprep.subr.bf16.mxu0 %v4592_v6  ;;  %v4615_v31 = vld [vmem:[#allocation5 + $0x1b4] ss:$24 sps:$4 sm:$0xff]   ;;  %v115_v32 = vld [vmem:[#allocation2] sm:$0xff]  ;;  %v4653_v38 = vld [vmem:[#allocation5 + $0x158] ss:$24 sps:$4 sm:$0xff]   ;;  %s5485_s6 = smov [#allocation14]  }
  0x8a   :  { %v4647_v34 = vld [vmem:[#allocation5 + $0x128] ss:$24 sps:$4 sm:$0xff]   ;;  %v5616_v35 = vcombine.high %v115_v32, %v115_v32  ;;  %v4649_v36 = vld [vmem:[#allocation5 + $0x15c] ss:$24 sps:$4 sm:$0xff]   ;;  %v4655_v40 = vld [vmem:[#allocation5 + $0x18c] ss:$24 sps:$4 sm:$0xff]   ;;  %v5620_v63 = vcombine.low %v115_v32, %v115_v32 }
  0x8b   :  { %2652 = vmatpush1.bf16.msra.mxu1 %v4623_v17  ;;  %v4621_v37 = vld [vmem:[#allocation5 + $0x1e4] ss:$24 sps:$4 sm:$0xff]   ;;  %v4624_v39 = vld [vmem:[#allocation5 + $0x1e0] ss:$24 sps:$4 sm:$0xff]   ;;  %v4627_v41 = vld [vmem:[#allocation5 + $0x214] ss:$24 sps:$4 sm:$0xff]  }
  0x8c   :  { %2490 = vmatpush1.bf16.msra.mxu0 %v4594_v7  ;;  %2653 = vmatprep.subr.bf16.mxu1 %v4625_v18  ;;  %v4630_v42 = vld [vmem:[#allocation5 + $0x210] ss:$24 sps:$4 sm:$0xff]   ;;  %v4663_v44 = vld [vmem:[#allocation5 + $0x1bc] ss:$24 sps:$4 sm:$0xff]   ;;  %v4636_v47 = vld [vmem:[#allocation5 + $0x240] ss:$24 sps:$4 sm:$0xff]  }
  0x8d   :  { %2491 = vmatprep.subr.bf16.mxu0 %v4595_v9  ;;  %2515 = vmatprep.mubr.bf16.mxu0 %v5616_v35  ;;  %v4661_v43 = vld [vmem:[#allocation5 + $0x188] ss:$24 sps:$4 sm:$0xff]   ;;  %v4633_v45 = vld [vmem:[#allocation5 + $0x244] ss:$24 sps:$4 sm:$0xff]   ;;  %v4668_v46 = vld [vmem:[#allocation5 + $0x1b8] ss:$24 sps:$4 sm:$0xff]  }
  0x8e   :  { %2679 = vmatprep.mubr.bf16.mxu1 %v5616_v35  ;;  %v4669_v48 = vld [vmem:[#allocation5 + $0x1ec] ss:$24 sps:$4 sm:$0xff]   ;;  %v4642_v50 = vld [vmem:[#allocation5 + $0x270] ss:$24 sps:$4 sm:$0xff]   ;;  %v4675_v52 = vld [vmem:[#allocation5 + $0x21c] ss:$24 sps:$4 sm:$0xff]  }
  0x8f   :  { %2654 = vmatpush1.bf16.msra.mxu1 %v4629_v20  ;;  %v4639_v49 = vld [vmem:[#allocation5 + $0x274] ss:$24 sps:$4 sm:$0xff]   ;;  %v4674_v51 = vld [vmem:[#allocation5 + $0x1e8] ss:$24 sps:$4 sm:$0xff]   ;;  %v4645_v53 = vld [vmem:[#allocation5 + $0x2a4] ss:$24 sps:$4 sm:$0xff]  }
  0x90   :  { %2492 = vmatpush1.bf16.msra.mxu0 %v4597_v12  ;;  %2655 = vmatprep.subr.bf16.mxu1 %v4631_v22  ;;  %v4648_v54 = vld [vmem:[#allocation5 + $0x2a0] ss:$24 sps:$4 sm:$0xff]   ;;  %v4681_v56 = vld [vmem:[#allocation5 + $0x24c] ss:$24 sps:$4 sm:$0xff]   ;;  %v4654_v58 = vld [vmem:[#allocation5 + $0x2d0] ss:$24 sps:$4 sm:$0xff]  }
  0x91   :  { %2493 = vmatprep.subr.bf16.mxu0 %v4598_v13  ;;  %v4680_v55 = vld [vmem:[#allocation5 + $0x218] ss:$24 sps:$4 sm:$0xff]   ;;  %v4651_v57 = vld [vmem:[#allocation5 + $0x2d4] ss:$24 sps:$4 sm:$0xff]   ;;  %v4686_v59 = vld [vmem:[#allocation5 + $0x248] ss:$24 sps:$4 sm:$0xff]  }
  0x92   :  { %v4687_v60 = vld [vmem:[#allocation5 + $0x27c] ss:$24 sps:$4 sm:$0xff]   ;;  %v4658_v62 = vld [vmem:[#allocation5 + $0x300] ss:$24 sps:$4 sm:$0xff]   ;;  %v4693_v1 = vld [vmem:[#allocation5 + $0x2ac] ss:$24 sps:$4 sm:$0xff]  }
  0x93   :  { %2656 = vmatpush1.bf16.msra.mxu1 %v4635_v25  ;;  %v4660_v61 = vld [vmem:[#allocation5 + $0x304] ss:$24 sps:$4 sm:$0xff]   ;;  %v4692_v0 = vld [vmem:[#allocation5 + $0x278] ss:$24 sps:$4 sm:$0xff]   ;;  %v4667_v2 = vld [vmem:[#allocation5 + $0x334] ss:$24 sps:$4 sm:$0xff]  }
  0x94   :  { %2494 = vmatpush1.bf16.msra.mxu0 %v4600_v16  ;;  %2657 = vmatprep.subr.bf16.mxu1 %v4637_v26  ;;  %v4665_v3 = vld [vmem:[#allocation5 + $0x330] ss:$24 sps:$4 sm:$0xff]   ;;  %v4699_v5 = vld [vmem:[#allocation5 + $0x2dc] ss:$24 sps:$4 sm:$0xff]   ;;  %v4671_v7 = vld [vmem:[#allocation5 + $0x360] ss:$24 sps:$4 sm:$0xff]  }
  0x95   :  { %2495 = vmatprep.subr.bf16.mxu0 %v4601_v19  ;;  %v4698_v4 = vld [vmem:[#allocation5 + $0x2a8] ss:$24 sps:$4 sm:$0xff]   ;;  %v4673_v6 = vld [vmem:[#allocation5 + $0x364] ss:$24 sps:$4 sm:$0xff]   ;;  %v4704_v8 = vld [vmem:[#allocation5 + $0x2d8] ss:$24 sps:$4 sm:$0xff]  }
  0x96   :  { %v4707_v9 = vld [vmem:[#allocation5 + $0x30c] ss:$24 sps:$4 sm:$0xff]   ;;  %v4677_v11 = vld [vmem:[#allocation5 + $0x390] ss:$24 sps:$4 sm:$0xff]   ;;  %v4713_v13 = vld [vmem:[#allocation5 + $0x33c] ss:$24 sps:$4 sm:$0xff]  }
  0x97   :  { %2658 = vmatpush1.bf16.msra.mxu1 %v4641_v28  ;;  %v4679_v10 = vld [vmem:[#allocation5 + $0x394] ss:$24 sps:$4 sm:$0xff]   ;;  %v4705_v12 = vld [vmem:[#allocation5 + $0x308] ss:$24 sps:$4 sm:$0xff]   ;;  %v4685_v14 = vld [vmem:[#allocation5 + $0x3c4] ss:$24 sps:$4 sm:$0xff]  }
  0x98   :  { %2496 = vmatpush1.bf16.msra.mxu0 %v4603_v21  ;;  %2659 = vmatprep.subr.bf16.mxu1 %v4643_v30  ;;  %v5623_v15 = vld [vmem:[#allocation2 + $0x8] sm:$0xff]  ;;  %v4683_v16 = vld [vmem:[#allocation5 + $0x3c0] ss:$24 sps:$4 sm:$0xff]   ;;  %v4710_v32 = vld [vmem:[#allocation5 + $0x484] ss:$24 sps:$4 sm:$0xff]   ;;  %s3961_s14 = sshll.u32 %s5485_s6, 4  ;;  %s3962_s14 = int_to_ptr.vmem [resolvable:$true] %s3961_s14 }
  0x99   :  { %2497 = vmatprep.subr.bf16.mxu0 %v4604_v23  ;;  %v5628_v17 = vcombine.high %v5623_v15, %v5623_v15  ;;  %v4711_v18 = vld [vmem:[#allocation5 + $0x338] ss:$24 sps:$4 sm:$0xff]   ;;  %v4719_v19 = vld [vmem:[#allocation5 + $0x36c] ss:$24 sps:$4 sm:$0xff]   ;;  %v4717_v22 = vld [vmem:[#allocation5 + $0x368] ss:$24 sps:$4 sm:$0xff]   ;;  %p5446_p1 = scmp.lt.s32.totalorder %s3962_s14, %s3962_s14 }
  0x9a   :  { %v4691_v20 = vld [vmem:[#allocation5 + $0x3f4] ss:$24 sps:$4 sm:$0xff]   ;;  %v4689_v21 = vld [vmem:[#allocation5 + $0x3f0] ss:$24 sps:$4 sm:$0xff]   ;;  %v4695_v25 = vld [vmem:[#allocation5 + $0x420] ss:$24 sps:$4 sm:$0xff]  }
  0x9b   :  { %2660 = vmatpush1.bf16.msra.mxu1 %v4647_v34  ;;  %v4725_v23 = vld [vmem:[#allocation5 + $0x39c] ss:$24 sps:$4 sm:$0xff]   ;;  %v4723_v26 = vld [vmem:[#allocation5 + $0x398] ss:$24 sps:$4 sm:$0xff]   ;;  %v4729_v30 = vld [vmem:[#allocation5 + $0x3c8] ss:$24 sps:$4 sm:$0xff]  }
  0x9c   :  { %2498 = vmatpush1.bf16.msra.mxu0 %v4606_v24  ;;  %2661 = vmatprep.subr.bf16.mxu1 %v4649_v36  ;;  %v4697_v24 = vld [vmem:[#allocation5 + $0x424] ss:$24 sps:$4 sm:$0xff]   ;;  %v4703_v28 = vld [vmem:[#allocation5 + $0x454] ss:$24 sps:$4 sm:$0xff]   ;;  %v4735_v34 = vld [vmem:[#allocation5 + $0x3f8] ss:$24 sps:$4 sm:$0xff]  }
  0x9d   :  { %2499 = vmatprep.subr.bf16.mxu0 %v4609_v27  ;;  %v4731_v27 = vld [vmem:[#allocation5 + $0x3cc] ss:$24 sps:$4 sm:$0xff]   ;;  %s5441_s15 = scalar_lea.vmem %s3962_s14, 768 }
  0x9e   :  { %v4743_v36 = vld [vmem:[#allocation5 + $0x42c] ss:$24 sps:$4 sm:$0xff]   ;;  %p5442_p0 = scmp.ne.s32.totalorder %s3962_s14, %s5441_s15  ;;  %p5447_p2 = scmp.lt.s32.totalorder %s5441_s15, %s5441_s15 }
  0x9f   :  { %2662 = vmatpush1.bf16.msra.mxu1 %v4653_v38  ;;  %v4714_v38 = vld [vmem:[#allocation5 + $0x4b0] ss:$24 sps:$4 sm:$0xff]  }
  0xa0   :  { %2500 = vmatpush1.bf16.msra.mxu0 %v4612_v29  ;;  %2663 = vmatprep.subr.bf16.mxu1 %v4655_v40  ;;  %v4701_v29 = vld [vmem:[#allocation5 + $0x450] ss:$24 sps:$4 sm:$0xff]   ;;  %v4749_v40 = vld [vmem:[#allocation5 + $0x45c] ss:$24 sps:$4 sm:$0xff]   ;;  %p5448_p3 = por %p5447_p2, %p5446_p1 }
  0xa1   :  { %2501 = vmatprep.subr.bf16.mxu0 %v4615_v31  ;;  %v4737_v31 = vld [vmem:[#allocation5 + $0x3fc] ss:$24 sps:$4 sm:$0xff]  }
  0xa2   :  { %p5449_p4 = pnand %p5448_p3, %p5442_p0 }
  0xa3   :  { %2664 = vmatpush1.bf16.msra.mxu1 %v4661_v43  ;;  %v4747_v43 = vld [vmem:[#allocation5 + $0x458] ss:$24 sps:$4 sm:$0xff]  }
  0xa4   :  { %2502 = vmatpush1.bf16.msra.mxu0 %v4618_v33  ;;  %2665 = vmatprep.subr.bf16.mxu1 %v4663_v44  ;;  %v4708_v33 = vld [vmem:[#allocation5 + $0x480] ss:$24 sps:$4 sm:$0xff]   ;;  %v4755_v44 = vld [vmem:[#allocation5 + $0x48c] ss:$24 sps:$4 sm:$0xff]  }
  0xa5   :  { %2503 = vmatprep.subr.bf16.mxu0 %v4621_v37  ;;  %v4716_v37 = vld [vmem:[#allocation5 + $0x4b4] ss:$24 sps:$4 sm:$0xff]  }
  0xa7   :  { %2666 = vmatpush1.bf16.msra.mxu1 %v4668_v46  ;;  %v4726_v46 = vld [vmem:[#allocation5 + $0x510] ss:$24 sps:$4 sm:$0xff]  }
  0xa8   :  { %2504 = vmatpush1.bf16.msra.mxu0 %v4624_v39  ;;  %2667 = vmatprep.subr.bf16.mxu1 %v4669_v48  ;;  %v4741_v39 = vld [vmem:[#allocation5 + $0x428] ss:$24 sps:$4 sm:$0xff]   ;;  %v4763_v48 = vld [vmem:[#allocation5 + $0x4bc] ss:$24 sps:$4 sm:$0xff]  }
  0xa9   :  { %2505 = vmatprep.subr.bf16.mxu0 %v4627_v41  ;;  %v4722_v41 = vld [vmem:[#allocation5 + $0x4e4] ss:$24 sps:$4 sm:$0xff]  }
  0xab   :  { %2668 = vmatpush1.bf16.msra.mxu1 %v4674_v51  ;;  %v4761_v51 = vld [vmem:[#allocation5 + $0x4b8] ss:$24 sps:$4 sm:$0xff]  }
  0xac   :  { %2506 = vmatpush1.bf16.msra.mxu0 %v4630_v42  ;;  %2669 = vmatprep.subr.bf16.mxu1 %v4675_v52  ;;  %v4720_v42 = vld [vmem:[#allocation5 + $0x4e0] ss:$24 sps:$4 sm:$0xff]   ;;  %v4769_v52 = vld [vmem:[#allocation5 + $0x4ec] ss:$24 sps:$4 sm:$0xff]  }
  0xad   :  { %2507 = vmatprep.subr.bf16.mxu0 %v4633_v45  ;;  %v4728_v45 = vld [vmem:[#allocation5 + $0x514] ss:$24 sps:$4 sm:$0xff]  }
  0xaf   :  { %2670 = vmatpush1.bf16.msra.mxu1 %v4680_v55  ;;  %v4767_v55 = vld [vmem:[#allocation5 + $0x4e8] ss:$24 sps:$4 sm:$0xff]  }
  0xb0   :  { %2508 = vmatpush1.bf16.msra.mxu0 %v4636_v47  ;;  %2671 = vmatprep.subr.bf16.mxu1 %v4681_v56  ;;  %v4753_v47 = vld [vmem:[#allocation5 + $0x488] ss:$24 sps:$4 sm:$0xff]   ;;  %v4775_v56 = vld [vmem:[#allocation5 + $0x51c] ss:$24 sps:$4 sm:$0xff]  }
  0xb1   :  { %2509 = vmatprep.subr.bf16.mxu0 %v4639_v49  ;;  %v4734_v49 = vld [vmem:[#allocation5 + $0x544] ss:$24 sps:$4 sm:$0xff]  }
  0xb3   :  { %2672 = vmatpush1.bf16.msra.mxu1 %v4686_v59  ;;  %v4744_v59 = vld [vmem:[#allocation5 + $0x5a0] ss:$24 sps:$4 sm:$0xff]  }
  0xb4   :  { %2510 = vmatpush1.bf16.msra.mxu0 %v4642_v50  ;;  %2673 = vmatprep.subr.bf16.mxu1 %v4687_v60  ;;  %v4732_v50 = vld [vmem:[#allocation5 + $0x540] ss:$24 sps:$4 sm:$0xff]   ;;  %v4781_v60 = vld [vmem:[#allocation5 + $0x54c] ss:$24 sps:$4 sm:$0xff]  }
  0xb5   :  { %2511 = vmatprep.subr.bf16.mxu0 %v4645_v53  ;;  %v4740_v53 = vld [vmem:[#allocation5 + $0x574] ss:$24 sps:$4 sm:$0xff]  }
  0xb7   :  { %2674 = vmatpush1.bf16.msra.mxu1 %v4692_v0  ;;  %v4750_v0 = vld [vmem:[#allocation5 + $0x5d0] ss:$24 sps:$4 sm:$0xff]  }
  0xb8   :  { %2512 = vmatpush1.bf16.msra.mxu0 %v4648_v54  ;;  %2675 = vmatprep.subr.bf16.mxu1 %v4693_v1  ;;  %v4738_v54 = vld [vmem:[#allocation5 + $0x570] ss:$24 sps:$4 sm:$0xff]   ;;  %v4787_v1 = vld [vmem:[#allocation5 + $0x57c] ss:$24 sps:$4 sm:$0xff]  }
  0xb9   :  { %2513 = vmatprep.subr.bf16.mxu0 %v4651_v57  ;;  %v4746_v57 = vld [vmem:[#allocation5 + $0x5a4] ss:$24 sps:$4 sm:$0xff]  }
  0xbb   :  { %2676 = vmatpush1.bf16.msra.mxu1 %v4698_v4  ;;  %v5636_v4 = vcombine.low %v5623_v15, %v5623_v15  ;;  %v4770_v15 = vld [vmem:[#allocation5 + $0x660] ss:$24 sps:$4 sm:$0xff]  }
  0xbc   :  { %2514 = vmatpush1.bf16.msra.mxu0 %v4654_v58  ;;  %2677 = vmatprep.subr.bf16.mxu1 %v4699_v5  ;;  %v4773_v58 = vld [vmem:[#allocation5 + $0x518] ss:$24 sps:$4 sm:$0xff]  }
  0xbd   :  { %2524 = vmatprep.subr.bf16.mxu0 %v4660_v61  ;;  %v4752_v61 = vld [vmem:[#allocation5 + $0x5d4] ss:$24 sps:$4 sm:$0xff]   ;;  %v4785_v5 = vld [vmem:[#allocation5 + $0x578] ss:$24 sps:$4 sm:$0xff]  }
  0xbf   :  { %2516 = vmatmul.mubr.bf16.vlgmr.msra.gmra.mrb[0].mxu0 %v5620_v63  ;;  %2678 = vmatpush1.bf16.msra.mxu1 %v4704_v8  ;;  %v4766_v8 = vld [vmem:[#allocation5 + $0x634] ss:$24 sps:$4 sm:$0xff]  }
  0xc0   :  { %2525 = vmatpush1.bf16.msra.mxu0 %v4658_v62  ;;  %2688 = vmatprep.subr.bf16.mxu1 %v4707_v9  ;;  %v4779_v62 = vld [vmem:[#allocation5 + $0x548] ss:$24 sps:$4 sm:$0xff]  }
  0xc1   :  { %2526 = vmatprep.subr.bf16.mxu0 %v4667_v2  ;;  %2556 = vmatprep.mubr.bf16.mxu0 %v5628_v17  ;;  %v4760_v2 = vld [vmem:[#allocation5 + $0x604] ss:$24 sps:$4 sm:$0xff]  }
  0xc2   :  { %2680 = vmatmul.mubr.bf16.vlgmr.msra.gmra.mrb[0].mxu1 %v5620_v63 }
  0xc3   :  { %2689 = vmatpush1.bf16.msra.mxu1 %v4705_v12  ;;  %2720 = vmatprep.mubr.bf16.mxu1 %v5628_v17  ;;  %v4799_v12 = vld [vmem:[#allocation5 + $0x5dc] ss:$24 sps:$4 sm:$0xff]  }
  0xc4   :  { %2527 = vmatpush1.bf16.msra.mxu0 %v4665_v3  ;;  %2690 = vmatprep.subr.bf16.mxu1 %v4713_v13  ;;  %v5632_v3 = vld [vmem:[#allocation2 + $0x10] sm:$0xff]  ;;  %v4772_v13 = vld [vmem:[#allocation5 + $0x664] ss:$24 sps:$4 sm:$0xff]  }
  0xc5   :  { %2528 = vmatprep.subr.bf16.mxu0 %v4673_v6  ;;  %v4758_v6 = vld [vmem:[#allocation5 + $0x600] ss:$24 sps:$4 sm:$0xff]   ;;  %v5640_v9 = vcombine.high %v5632_v3, %v5632_v3 }
  0xc7   :  { %2691 = vmatpush1.bf16.msra.mxu1 %v4711_v18  ;;  %v4778_v18 = vld [vmem:[#allocation5 + $0x694] ss:$24 sps:$4 sm:$0xff]  }
  0xc8   :  { %2529 = vmatpush1.bf16.msra.mxu0 %v4671_v7  ;;  %2692 = vmatprep.subr.bf16.mxu1 %v4719_v19  ;;  %v4793_v7 = vld [vmem:[#allocation5 + $0x5ac] ss:$24 sps:$4 sm:$0xff]   ;;  %v4803_v19 = vld [vmem:[#allocation5 + $0x608] ss:$24 sps:$4 sm:$0xff]  }
  0xc9   :  { %2530 = vmatprep.subr.bf16.mxu0 %v4679_v10  ;;  %v4791_v10 = vld [vmem:[#allocation5 + $0x5a8] ss:$24 sps:$4 sm:$0xff]  }
  0xcb   :  { %2693 = vmatpush1.bf16.msra.mxu1 %v4717_v22  ;;  %v4784_v22 = vld [vmem:[#allocation5 + $0x6c4] ss:$24 sps:$4 sm:$0xff]  }
  0xcc   :  { %2531 = vmatpush1.bf16.msra.mxu0 %v4677_v11  ;;  %2694 = vmatprep.subr.bf16.mxu1 %v4725_v23  ;;  %v4764_v11 = vld [vmem:[#allocation5 + $0x630] ss:$24 sps:$4 sm:$0xff]  }
  0xcd   :  { %2532 = vmatprep.subr.bf16.mxu0 %v4685_v14  ;;  %v4797_v14 = vld [vmem:[#allocation5 + $0x5d8] ss:$24 sps:$4 sm:$0xff]  }
  0xce   :  { %v4809_v23 = vld [vmem:[#allocation5 + $0x638] ss:$24 sps:$4 sm:$0xff]  }
  0xcf   :  { %2695 = vmatpush1.bf16.msra.mxu1 %v4723_v26  ;;  %v4790_v26 = vld [vmem:[#allocation5 + $0x6f4] ss:$24 sps:$4 sm:$0xff]  }
  0xd0   :  { %2533 = vmatpush1.bf16.msra.mxu0 %v4683_v16  ;;  %2696 = vmatprep.subr.bf16.mxu1 %v4731_v27  ;;  %v4805_v16 = vld [vmem:[#allocation5 + $0x60c] ss:$24 sps:$4 sm:$0xff]   ;;  %v4815_v27 = vld [vmem:[#allocation5 + $0x668] ss:$24 sps:$4 sm:$0xff]  }
  0xd1   :  { %2534 = vmatprep.subr.bf16.mxu0 %v4691_v20  ;;  %v4776_v20 = vld [vmem:[#allocation5 + $0x690] ss:$24 sps:$4 sm:$0xff]  }
  0xd3   :  { %2697 = vmatpush1.bf16.msra.mxu1 %v4729_v30  ;;  %v4796_v30 = vld [vmem:[#allocation5 + $0x724] ss:$24 sps:$4 sm:$0xff]  }
  0xd4   :  { %2535 = vmatpush1.bf16.msra.mxu0 %v4689_v21  ;;  %2698 = vmatprep.subr.bf16.mxu1 %v4737_v31  ;;  %v4811_v21 = vld [vmem:[#allocation5 + $0x63c] ss:$24 sps:$4 sm:$0xff]   ;;  %v4821_v31 = vld [vmem:[#allocation5 + $0x698] ss:$24 sps:$4 sm:$0xff]  }
  0xd5   :  { %2536 = vmatprep.subr.bf16.mxu0 %v4697_v24  ;;  %v4782_v24 = vld [vmem:[#allocation5 + $0x6c0] ss:$24 sps:$4 sm:$0xff]  }
  0xd7   :  { %2699 = vmatpush1.bf16.msra.mxu1 %v4735_v34  ;;  %v4802_v34 = vld [vmem:[#allocation5 + $0x754] ss:$24 sps:$4 sm:$0xff]  }
  0xd8   :  { %2537 = vmatpush1.bf16.msra.mxu0 %v4695_v25  ;;  %2700 = vmatprep.subr.bf16.mxu1 %v4743_v36  ;;  %v4817_v25 = vld [vmem:[#allocation5 + $0x66c] ss:$24 sps:$4 sm:$0xff]   ;;  %v4827_v36 = vld [vmem:[#allocation5 + $0x6c8] ss:$24 sps:$4 sm:$0xff]  }
  0xd9   :  { %2538 = vmatprep.subr.bf16.mxu0 %v4703_v28  ;;  %v4788_v28 = vld [vmem:[#allocation5 + $0x6f0] ss:$24 sps:$4 sm:$0xff]  }
  0xdb   :  { %2701 = vmatpush1.bf16.msra.mxu1 %v4741_v39  ;;  %v4808_v39 = vld [vmem:[#allocation5 + $0x784] ss:$24 sps:$4 sm:$0xff]  }
  0xdc   :  { %2539 = vmatpush1.bf16.msra.mxu0 %v4701_v29  ;;  %2702 = vmatprep.subr.bf16.mxu1 %v4749_v40  ;;  %v4823_v29 = vld [vmem:[#allocation5 + $0x69c] ss:$24 sps:$4 sm:$0xff]   ;;  %v4833_v40 = vld [vmem:[#allocation5 + $0x6f8] ss:$24 sps:$4 sm:$0xff]  }
  0xdd   :  { %2540 = vmatprep.subr.bf16.mxu0 %v4710_v32  ;;  %v4794_v32 = vld [vmem:[#allocation5 + $0x720] ss:$24 sps:$4 sm:$0xff]  }
  0xdf   :  { %2703 = vmatpush1.bf16.msra.mxu1 %v4747_v43  ;;  %v4814_v43 = vld [vmem:[#allocation5 + $0x7b4] ss:$24 sps:$4 sm:$0xff]  }
  0xe0   :  { %2541 = vmatpush1.bf16.msra.mxu0 %v4708_v33  ;;  %2704 = vmatprep.subr.bf16.mxu1 %v4755_v44  ;;  %v4829_v33 = vld [vmem:[#allocation5 + $0x6cc] ss:$24 sps:$4 sm:$0xff]   ;;  %v4839_v44 = vld [vmem:[#allocation5 + $0x728] ss:$24 sps:$4 sm:$0xff]  }
  0xe1   :  { %2542 = vmatprep.subr.bf16.mxu0 %v4716_v37  ;;  %v4800_v37 = vld [vmem:[#allocation5 + $0x750] ss:$24 sps:$4 sm:$0xff]  }
  0xe3   :  { %2705 = vmatpush1.bf16.msra.mxu1 %v4753_v47  ;;  %v4820_v47 = vld [vmem:[#allocation5 + $0x7e4] ss:$24 sps:$4 sm:$0xff]  }
  0xe4   :  { %2543 = vmatpush1.bf16.msra.mxu0 %v4714_v38  ;;  %2706 = vmatprep.subr.bf16.mxu1 %v4763_v48  ;;  %v4835_v38 = vld [vmem:[#allocation5 + $0x6fc] ss:$24 sps:$4 sm:$0xff]   ;;  %v4845_v48 = vld [vmem:[#allocation5 + $0x758] ss:$24 sps:$4 sm:$0xff]  }
  0xe5   :  { %2544 = vmatprep.subr.bf16.mxu0 %v4722_v41  ;;  %v4806_v41 = vld [vmem:[#allocation5 + $0x780] ss:$24 sps:$4 sm:$0xff]  }
  0xe7   :  { %2707 = vmatpush1.bf16.msra.mxu1 %v4761_v51  ;;  %v4826_v51 = vld [vmem:[#allocation5 + $0x814] ss:$24 sps:$4 sm:$0xff]  }
  0xe8   :  { %2545 = vmatpush1.bf16.msra.mxu0 %v4720_v42  ;;  %2708 = vmatprep.subr.bf16.mxu1 %v4769_v52  ;;  %v4841_v42 = vld [vmem:[#allocation5 + $0x72c] ss:$24 sps:$4 sm:$0xff]   ;;  %v4851_v52 = vld [vmem:[#allocation5 + $0x788] ss:$24 sps:$4 sm:$0xff]  }
  0xe9   :  { %2546 = vmatprep.subr.bf16.mxu0 %v4728_v45  ;;  %v4812_v45 = vld [vmem:[#allocation5 + $0x7b0] ss:$24 sps:$4 sm:$0xff]  }
  0xeb   :  { %2709 = vmatpush1.bf16.msra.mxu1 %v4767_v55  ;;  %v4832_v55 = vld [vmem:[#allocation5 + $0x844] ss:$24 sps:$4 sm:$0xff]  }
  0xec   :  { %2547 = vmatpush1.bf16.msra.mxu0 %v4726_v46  ;;  %2710 = vmatprep.subr.bf16.mxu1 %v4775_v56  ;;  %v4847_v46 = vld [vmem:[#allocation5 + $0x75c] ss:$24 sps:$4 sm:$0xff]   ;;  %v4859_v56 = vld [vmem:[#allocation5 + $0x7b8] ss:$24 sps:$4 sm:$0xff]  }
  0xed   :  { %2548 = vmatprep.subr.bf16.mxu0 %v4734_v49  ;;  %v4818_v49 = vld [vmem:[#allocation5 + $0x7e0] ss:$24 sps:$4 sm:$0xff]  }
  0xef   :  { %2711 = vmatpush1.bf16.msra.mxu1 %v4773_v58  ;;  %v4867_v58 = vld [vmem:[#allocation5 + $0x7ec] ss:$24 sps:$4 sm:$0xff]  }
  0xf0   :  { %2549 = vmatpush1.bf16.msra.mxu0 %v4732_v50  ;;  %2712 = vmatprep.subr.bf16.mxu1 %v4781_v60  ;;  %v4853_v50 = vld [vmem:[#allocation5 + $0x78c] ss:$24 sps:$4 sm:$0xff]   ;;  %v4865_v60 = vld [vmem:[#allocation5 + $0x7e8] ss:$24 sps:$4 sm:$0xff]  }
  0xf1   :  { %2550 = vmatprep.subr.bf16.mxu0 %v4740_v53  ;;  %v4824_v53 = vld [vmem:[#allocation5 + $0x810] ss:$24 sps:$4 sm:$0xff]  }
  0xf3   :  { %2713 = vmatpush1.bf16.msra.mxu1 %v4779_v62  ;;  %v4873_v62 = vld [vmem:[#allocation5 + $0x81c] ss:$24 sps:$4 sm:$0xff]  }
  0xf4   :  { %2551 = vmatpush1.bf16.msra.mxu0 %v4738_v54  ;;  %2714 = vmatprep.subr.bf16.mxu1 %v4787_v1  ;;  %v4861_v54 = vld [vmem:[#allocation5 + $0x7bc] ss:$24 sps:$4 sm:$0xff]   ;;  %v4871_v1 = vld [vmem:[#allocation5 + $0x818] ss:$24 sps:$4 sm:$0xff]  }
  0xf5   :  { %2552 = vmatprep.subr.bf16.mxu0 %v4746_v57  ;;  %v4830_v57 = vld [vmem:[#allocation5 + $0x840] ss:$24 sps:$4 sm:$0xff]  }
  0xf7   :  { %2715 = vmatpush1.bf16.msra.mxu1 %v4785_v5  ;;  %v4879_v5 = vld [vmem:[#allocation5 + $0x84c] ss:$24 sps:$4 sm:$0xff]  }
  0xf8   :  { %2553 = vmatpush1.bf16.msra.mxu0 %v4744_v59  ;;  %2716 = vmatprep.subr.bf16.mxu1 %v4793_v7  ;;  %v4838_v59 = vld [vmem:[#allocation5 + $0x874] ss:$24 sps:$4 sm:$0xff]   ;;  %v4877_v7 = vld [vmem:[#allocation5 + $0x848] ss:$24 sps:$4 sm:$0xff]  }
  0xf9   :  { %2554 = vmatprep.subr.bf16.mxu0 %v4752_v61  ;;  %v4836_v61 = vld [vmem:[#allocation5 + $0x870] ss:$24 sps:$4 sm:$0xff]  }
  0xfb   :  { %2717 = vmatpush1.bf16.msra.mxu1 %v4791_v10  ;;  %v4885_v10 = vld [vmem:[#allocation5 + $0x87c] ss:$24 sps:$4 sm:$0xff]  }
  0xfc   :  { %2555 = vmatpush1.bf16.msra.mxu0 %v4750_v0  ;;  %2718 = vmatprep.subr.bf16.mxu1 %v4799_v12  ;;  %v4844_v0 = vld [vmem:[#allocation5 + $0x8a4] ss:$24 sps:$4 sm:$0xff]  }
  0xfd   :  { %2565 = vmatprep.subr.bf16.mxu0 %v4760_v2  ;;  %v4842_v2 = vld [vmem:[#allocation5 + $0x8a0] ss:$24 sps:$4 sm:$0xff]  }
  0xfe   :  { %v5646_v12 = vld [vmem:[#allocation2 + $0x18] sm:$0xff] }
  0xff   :  { %2557 = vmatmul.mubr.bf16.vlgmr.msra.gmra.mrb[0].mxu0 %v5636_v4  ;;  %2719 = vmatpush1.bf16.msra.mxu1 %v4797_v14  ;;  %v4883_v14 = vld [vmem:[#allocation5 + $0x878] ss:$24 sps:$4 sm:$0xff]  }
 0x100   :  { %2566 = vmatpush1.bf16.msra.mxu0 %v4758_v6  ;;  %2597 = vmatprep.mubr.bf16.mxu0 %v5640_v9  ;;  %v4850_v6 = vld [vmem:[#allocation5 + $0x8d4] ss:$24 sps:$4 sm:$0xff]  }
 0x101   :  { %2567 = vmatprep.subr.bf16.mxu0 %v4766_v8  ;;  %2729 = vmatprep.subr.bf16.mxu1 %v4805_v16  ;;  %v4848_v8 = vld [vmem:[#allocation5 + $0x8d0] ss:$24 sps:$4 sm:$0xff]   ;;  %v4891_v16 = vld [vmem:[#allocation5 + $0x8ac] ss:$24 sps:$4 sm:$0xff]  }
 0x102   :  { %2721 = vmatmul.mubr.bf16.vlgmr.msra.gmra.mrb[0].mxu1 %v5636_v4 }
 0x103   :  { %2730 = vmatpush1.bf16.msra.mxu1 %v4803_v19  ;;  %2761 = vmatprep.mubr.bf16.mxu1 %v5640_v9  ;;  %v5654_v19 = vcombine.high %v5646_v12, %v5646_v12 }
 0x104   :  { %2568 = vmatpush1.bf16.msra.mxu0 %v4764_v11  ;;  %2731 = vmatprep.subr.bf16.mxu1 %v4811_v21  ;;  %v4858_v11 = vld [vmem:[#allocation5 + $0x904] ss:$24 sps:$4 sm:$0xff]   ;;  %v4889_v21 = vld [vmem:[#allocation5 + $0x8a8] ss:$24 sps:$4 sm:$0xff]  }
 0x105   :  { %2569 = vmatprep.subr.bf16.mxu0 %v4772_v13  ;;  %v5650_v13 = vcombine.low %v5632_v3, %v5632_v3  ;;  %v4870_v3 = vld [vmem:[#allocation5 + $0x964] ss:$24 sps:$4 sm:$0xff]  }
 0x107   :  { %2732 = vmatpush1.bf16.msra.mxu1 %v4809_v23  ;;  %v4895_v23 = vld [vmem:[#allocation5 + $0x8d8] ss:$24 sps:$4 sm:$0xff]  }
 0x108   :  { %2570 = vmatpush1.bf16.msra.mxu0 %v4770_v15  ;;  %2733 = vmatprep.subr.bf16.mxu1 %v4817_v25  ;;  %v4856_v15 = vld [vmem:[#allocation5 + $0x900] ss:$24 sps:$4 sm:$0xff]   ;;  %v4876_v25 = vld [vmem:[#allocation5 + $0x994] ss:$24 sps:$4 sm:$0xff]  }
 0x109   :  { %2571 = vmatprep.subr.bf16.mxu0 %v4778_v18  ;;  %v4864_v18 = vld [vmem:[#allocation5 + $0x934] ss:$24 sps:$4 sm:$0xff]  }
 0x10b   :  { %2734 = vmatpush1.bf16.msra.mxu1 %v4815_v27  ;;  %v4901_v27 = vld [vmem:[#allocation5 + $0x908] ss:$24 sps:$4 sm:$0xff]  }
 0x10c   :  { %2572 = vmatpush1.bf16.msra.mxu0 %v4776_v20  ;;  %2735 = vmatprep.subr.bf16.mxu1 %v4823_v29  ;;  %v4862_v20 = vld [vmem:[#allocation5 + $0x930] ss:$24 sps:$4 sm:$0xff]   ;;  %v4882_v29 = vld [vmem:[#allocation5 + $0x9c4] ss:$24 sps:$4 sm:$0xff]  }
 0x10d   :  { %2573 = vmatprep.subr.bf16.mxu0 %v4784_v22  ;;  %v4897_v22 = vld [vmem:[#allocation5 + $0x8dc] ss:$24 sps:$4 sm:$0xff]  }
 0x10f   :  { %2736 = vmatpush1.bf16.msra.mxu1 %v4821_v31  ;;  %v4907_v31 = vld [vmem:[#allocation5 + $0x938] ss:$24 sps:$4 sm:$0xff]  }
 0x110   :  { %2574 = vmatpush1.bf16.msra.mxu0 %v4782_v24  ;;  %2737 = vmatprep.subr.bf16.mxu1 %v4829_v33  ;;  %v4868_v24 = vld [vmem:[#allocation5 + $0x960] ss:$24 sps:$4 sm:$0xff]   ;;  %v4888_v33 = vld [vmem:[#allocation5 + $0x9f4] ss:$24 sps:$4 sm:$0xff]  }
 0x111   :  { %2575 = vmatprep.subr.bf16.mxu0 %v4790_v26  ;;  %v4903_v26 = vld [vmem:[#allocation5 + $0x90c] ss:$24 sps:$4 sm:$0xff]  }
 0x113   :  { %2738 = vmatpush1.bf16.msra.mxu1 %v4827_v36  ;;  %v4913_v36 = vld [vmem:[#allocation5 + $0x968] ss:$24 sps:$4 sm:$0xff]  }
 0x114   :  { %2576 = vmatpush1.bf16.msra.mxu0 %v4788_v28  ;;  %2739 = vmatprep.subr.bf16.mxu1 %v4835_v38  ;;  %v4874_v28 = vld [vmem:[#allocation5 + $0x990] ss:$24 sps:$4 sm:$0xff]   ;;  %v4894_v38 = vld [vmem:[#allocation5 + $0xa24] ss:$24 sps:$4 sm:$0xff]  }
 0x115   :  { %2577 = vmatprep.subr.bf16.mxu0 %v4796_v30  ;;  %v4909_v30 = vld [vmem:[#allocation5 + $0x93c] ss:$24 sps:$4 sm:$0xff]  }
 0x117   :  { %2740 = vmatpush1.bf16.msra.mxu1 %v4833_v40  ;;  %v4919_v40 = vld [vmem:[#allocation5 + $0x998] ss:$24 sps:$4 sm:$0xff]  }
 0x118   :  { %2578 = vmatpush1.bf16.msra.mxu0 %v4794_v32  ;;  %2741 = vmatprep.subr.bf16.mxu1 %v4841_v42  ;;  %v4880_v32 = vld [vmem:[#allocation5 + $0x9c0] ss:$24 sps:$4 sm:$0xff]   ;;  %v4900_v42 = vld [vmem:[#allocation5 + $0xa54] ss:$24 sps:$4 sm:$0xff]  }
 0x119   :  { %2579 = vmatprep.subr.bf16.mxu0 %v4802_v34  ;;  %v4915_v34 = vld [vmem:[#allocation5 + $0x96c] ss:$24 sps:$4 sm:$0xff]  }
 0x11b   :  { %2742 = vmatpush1.bf16.msra.mxu1 %v4839_v44  ;;  %v4925_v44 = vld [vmem:[#allocation5 + $0x9c8] ss:$24 sps:$4 sm:$0xff]  }
 0x11c   :  { %2580 = vmatpush1.bf16.msra.mxu0 %v4800_v37  ;;  %2743 = vmatprep.subr.bf16.mxu1 %v4847_v46  ;;  %v4886_v37 = vld [vmem:[#allocation5 + $0x9f0] ss:$24 sps:$4 sm:$0xff]   ;;  %v4906_v46 = vld [vmem:[#allocation5 + $0xa84] ss:$24 sps:$4 sm:$0xff]  }
 0x11d   :  { %2581 = vmatprep.subr.bf16.mxu0 %v4808_v39  ;;  %v4921_v39 = vld [vmem:[#allocation5 + $0x99c] ss:$24 sps:$4 sm:$0xff]  }
 0x11f   :  { %2744 = vmatpush1.bf16.msra.mxu1 %v4845_v48  ;;  %v4931_v48 = vld [vmem:[#allocation5 + $0x9f8] ss:$24 sps:$4 sm:$0xff]  }
 0x120   :  { %2582 = vmatpush1.bf16.msra.mxu0 %v4806_v41  ;;  %2745 = vmatprep.subr.bf16.mxu1 %v4853_v50  ;;  %v4892_v41 = vld [vmem:[#allocation5 + $0xa20] ss:$24 sps:$4 sm:$0xff]   ;;  %v4912_v50 = vld [vmem:[#allocation5 + $0xab4] ss:$24 sps:$4 sm:$0xff]  }
 0x121   :  { %2583 = vmatprep.subr.bf16.mxu0 %v4814_v43  ;;  %v4927_v43 = vld [vmem:[#allocation5 + $0x9cc] ss:$24 sps:$4 sm:$0xff]  }
 0x123   :  { %2746 = vmatpush1.bf16.msra.mxu1 %v4851_v52  ;;  %v4937_v52 = vld [vmem:[#allocation5 + $0xa28] ss:$24 sps:$4 sm:$0xff]  }
 0x124   :  { %2584 = vmatpush1.bf16.msra.mxu0 %v4812_v45  ;;  %2747 = vmatprep.subr.bf16.mxu1 %v4861_v54  ;;  %v4898_v45 = vld [vmem:[#allocation5 + $0xa50] ss:$24 sps:$4 sm:$0xff]   ;;  %v4918_v54 = vld [vmem:[#allocation5 + $0xae4] ss:$24 sps:$4 sm:$0xff]  }
 0x125   :  { %2585 = vmatprep.subr.bf16.mxu0 %v4820_v47  ;;  %v4933_v47 = vld [vmem:[#allocation5 + $0x9fc] ss:$24 sps:$4 sm:$0xff]  }
 0x127   :  { %2748 = vmatpush1.bf16.msra.mxu1 %v4859_v56  ;;  %v4943_v56 = vld [vmem:[#allocation5 + $0xa58] ss:$24 sps:$4 sm:$0xff]  }
 0x128   :  { %2586 = vmatpush1.bf16.msra.mxu0 %v4818_v49  ;;  %2749 = vmatprep.subr.bf16.mxu1 %v4867_v58  ;;  %v4904_v49 = vld [vmem:[#allocation5 + $0xa80] ss:$24 sps:$4 sm:$0xff]   ;;  %v4924_v58 = vld [vmem:[#allocation5 + $0xb14] ss:$24 sps:$4 sm:$0xff]  }
 0x129   :  { %2587 = vmatprep.subr.bf16.mxu0 %v4826_v51  ;;  %v4939_v51 = vld [vmem:[#allocation5 + $0xa2c] ss:$24 sps:$4 sm:$0xff]  }
 0x12b   :  { %2750 = vmatpush1.bf16.msra.mxu1 %v4865_v60  ;;  %v4951_v60 = vld [vmem:[#allocation5 + $0xa88] ss:$24 sps:$4 sm:$0xff]  }
 0x12c   :  { %2588 = vmatpush1.bf16.msra.mxu0 %v4824_v53  ;;  %2751 = vmatprep.subr.bf16.mxu1 %v4873_v62  ;;  %v4910_v53 = vld [vmem:[#allocation5 + $0xab0] ss:$24 sps:$4 sm:$0xff]   ;;  %v4930_v62 = vld [vmem:[#allocation5 + $0xb44] ss:$24 sps:$4 sm:$0xff]  }
 0x12d   :  { %2589 = vmatprep.subr.bf16.mxu0 %v4832_v55  ;;  %v4945_v55 = vld [vmem:[#allocation5 + $0xa5c] ss:$24 sps:$4 sm:$0xff]  }
 0x12f   :  { %2752 = vmatpush1.bf16.msra.mxu1 %v4871_v1  ;;  %v4957_v1 = vld [vmem:[#allocation5 + $0xab8] ss:$24 sps:$4 sm:$0xff]  }
 0x130   :  { %2590 = vmatpush1.bf16.msra.mxu0 %v4830_v57  ;;  %2753 = vmatprep.subr.bf16.mxu1 %v4879_v5  ;;  %v4916_v57 = vld [vmem:[#allocation5 + $0xae0] ss:$24 sps:$4 sm:$0xff]   ;;  %v4936_v5 = vld [vmem:[#allocation5 + $0xb74] ss:$24 sps:$4 sm:$0xff]  }
 0x131   :  { %2591 = vmatprep.subr.bf16.mxu0 %v4838_v59  ;;  %v4953_v59 = vld [vmem:[#allocation5 + $0xa8c] ss:$24 sps:$4 sm:$0xff]  }
 0x133   :  { %2754 = vmatpush1.bf16.msra.mxu1 %v4877_v7  ;;  %v4963_v7 = vld [vmem:[#allocation5 + $0xae8] ss:$24 sps:$4 sm:$0xff]  }
 0x134   :  { %2592 = vmatpush1.bf16.msra.mxu0 %v4836_v61  ;;  %2755 = vmatprep.subr.bf16.mxu1 %v4885_v10  ;;  %v4922_v61 = vld [vmem:[#allocation5 + $0xb10] ss:$24 sps:$4 sm:$0xff]   ;;  %v4942_v10 = vld [vmem:[#allocation5 + $0xba4] ss:$24 sps:$4 sm:$0xff]  }
 0x135   :  { %2593 = vmatprep.subr.bf16.mxu0 %v4844_v0  ;;  %v4959_v0 = vld [vmem:[#allocation5 + $0xabc] ss:$24 sps:$4 sm:$0xff]  }
 0x137   :  { %2756 = vmatpush1.bf16.msra.mxu1 %v4883_v14  ;;  %v4969_v14 = vld [vmem:[#allocation5 + $0xb18] ss:$24 sps:$4 sm:$0xff]  }
 0x138   :  { %2594 = vmatpush1.bf16.msra.mxu0 %v4842_v2  ;;  %2757 = vmatprep.subr.bf16.mxu1 %v4891_v16  ;;  %v4928_v2 = vld [vmem:[#allocation5 + $0xb40] ss:$24 sps:$4 sm:$0xff]   ;;  %v4948_v16 = vld [vmem:[#allocation5 + $0xbd4] ss:$24 sps:$4 sm:$0xff]  }
 0x139   :  { %2595 = vmatprep.subr.bf16.mxu0 %v4850_v6  ;;  %v4965_v6 = vld [vmem:[#allocation5 + $0xaec] ss:$24 sps:$4 sm:$0xff]  }
 0x13b   :  { %2758 = vmatpush1.bf16.msra.mxu1 %v4889_v21  ;;  %v4946_v21 = vld [vmem:[#allocation5 + $0xbd0] ss:$24 sps:$4 sm:$0xff]  }
 0x13c   :  { %2596 = vmatpush1.bf16.msra.mxu0 %v4848_v8  ;;  %2759 = vmatprep.subr.bf16.mxu1 %v4897_v22  ;;  %v4934_v8 = vld [vmem:[#allocation5 + $0xb70] ss:$24 sps:$4 sm:$0xff]   ;;  %v4983_v22 = vld [vmem:[#allocation5 + $0xb7c] ss:$24 sps:$4 sm:$0xff]  }
 0x13d   :  { %2606 = vmatprep.subr.bf16.mxu0 %v4858_v11  ;;  %v4971_v11 = vld [vmem:[#allocation5 + $0xb1c] ss:$24 sps:$4 sm:$0xff]  }
 0x13f   :  { %2598 = vmatmul.mubr.bf16.vlgmr.msra.gmra.mrb[0].mxu0 %v5650_v13  ;;  %2760 = vmatpush1.bf16.msra.mxu1 %v4895_v23  ;;  %v4981_v23 = vld [vmem:[#allocation5 + $0xb78] ss:$24 sps:$4 sm:$0xff]  }
 0x140   :  { %2607 = vmatpush1.bf16.msra.mxu0 %v4856_v15  ;;  %2638 = vmatprep.mubr.bf16.mxu0 %v5654_v19  ;;  %v4940_v15 = vld [vmem:[#allocation5 + $0xba0] ss:$24 sps:$4 sm:$0xff]  }
 0x141   :  { %2608 = vmatprep.subr.bf16.mxu0 %v4864_v18  ;;  %2770 = vmatprep.subr.bf16.mxu1 %v4903_v26  ;;  %v4977_v18 = vld [vmem:[#allocation5 + $0xb4c] ss:$24 sps:$4 sm:$0xff]  }
 0x142   :  { %2762 = vmatmul.mubr.bf16.vlgmr.msra.gmra.mrb[0].mxu1 %v5650_v13  ;;  %v4962_v26 = vld [vmem:[#allocation5 + $0x44] ss:$24 sps:$4 sm:$0xff]  }
 0x143   :  { %2771 = vmatpush1.bf16.msra.mxu1 %v4901_v27  ;;  %2802 = vmatprep.mubr.bf16.mxu1 %v5654_v19  ;;  %v4989_v27 = vld [vmem:[#allocation5 + $0xbac] ss:$24 sps:$4 sm:$0xff]  }
 0x144   :  { %2609 = vmatpush1.bf16.msra.mxu0 %v4862_v20  ;;  %2772 = vmatprep.subr.bf16.mxu1 %v4909_v30  ;;  %v4975_v20 = vld [vmem:[#allocation5 + $0xb48] ss:$24 sps:$4 sm:$0xff]   ;;  %v4968_v30 = vld [vmem:[#allocation5 + $0x74] ss:$24 sps:$4 sm:$0xff]  }
 0x145   :  { %2610 = vmatprep.subr.bf16.mxu0 %v4870_v3  ;;  %v4956_v3 = vld [vmem:[#allocation5 + $0x14] ss:$24 sps:$4 sm:$0xff]  }
 0x147   :  { %2773 = vmatpush1.bf16.msra.mxu1 %v4907_v31  ;;  %v4995_v31 = vld [vmem:[#allocation5 + $0xbdc] ss:$24 sps:$4 sm:$0xff]  }
 0x148   :  { %2611 = vmatpush1.bf16.msra.mxu0 %v4868_v24  ;;  %2774 = vmatprep.subr.bf16.mxu1 %v4915_v34  ;;  %v4954_v24 = vld [vmem:[#allocation5 + $0x10] ss:$24 sps:$4 sm:$0xff]   ;;  %v4972_v34 = vld [vmem:[#allocation5 + $0xa0] ss:$24 sps:$4 sm:$0xff]  }
 0x149   :  { %2612 = vmatprep.subr.bf16.mxu0 %v4876_v25  ;;  %v5662_v25 = vcombine.low %v5646_v12, %v5646_v12  ;;  %v4966_v12 = vld [vmem:[#allocation5 + $0x70] ss:$24 sps:$4 sm:$0xff]  }
 0x14b   :  { %2775 = vmatpush1.bf16.msra.mxu1 %v4913_v36  ;;  %v4980_v36 = vld [vmem:[#allocation5 + $0xd4] ss:$24 sps:$4 sm:$0xff]  }
 0x14c   :  { %2613 = vmatpush1.bf16.msra.mxu0 %v4874_v28  ;;  %2776 = vmatprep.subr.bf16.mxu1 %v4921_v39  ;;  %v4987_v28 = vld [vmem:[#allocation5 + $0xba8] ss:$24 sps:$4 sm:$0xff]  }
 0x14d   :  { %2614 = vmatprep.subr.bf16.mxu0 %v4882_v29  ;;  %v4960_v29 = vld [vmem:[#allocation5 + $0x40] ss:$24 sps:$4 sm:$0xff]  }
 0x14e   :  { %v4984_v39 = vld [vmem:[#allocation5 + $0x100] ss:$24 sps:$4 sm:$0xff]  }
 0x14f   :  { %2777 = vmatpush1.bf16.msra.mxu1 %v4919_v40  ;;  %v4990_v40 = vld [vmem:[#allocation5 + $0x130] ss:$24 sps:$4 sm:$0xff]  }
 0x150   :  { %2615 = vmatpush1.bf16.msra.mxu0 %v4880_v32  ;;  %2778 = vmatprep.subr.bf16.mxu1 %v4927_v43  ;;  %v4993_v32 = vld [vmem:[#allocation5 + $0xbd8] ss:$24 sps:$4 sm:$0xff]   ;;  %v5001_v43 = vld [vmem:[#allocation5 + $0x194] ss:$24 sps:$4 sm:$0xff]  }
 0x151   :  { %2616 = vmatprep.subr.bf16.mxu0 %v4888_v33  ;;  %v4974_v33 = vld [vmem:[#allocation5 + $0xa4] ss:$24 sps:$4 sm:$0xff]  }
 0x153   :  { %2779 = vmatpush1.bf16.msra.mxu1 %v4925_v44  ;;  %v4999_v44 = vld [vmem:[#allocation5 + $0x190] ss:$24 sps:$4 sm:$0xff]  }
 0x154   :  { %2617 = vmatpush1.bf16.msra.mxu0 %v4886_v37  ;;  %2780 = vmatprep.subr.bf16.mxu1 %v4933_v47  ;;  %v4978_v37 = vld [vmem:[#allocation5 + $0xd0] ss:$24 sps:$4 sm:$0xff]   ;;  %v5007_v47 = vld [vmem:[#allocation5 + $0x1f4] ss:$24 sps:$4 sm:$0xff]  }
 0x155   :  { %2618 = vmatprep.subr.bf16.mxu0 %v4894_v38  ;;  %v4986_v38 = vld [vmem:[#allocation5 + $0x104] ss:$24 sps:$4 sm:$0xff]  }
 0x157   :  { %2781 = vmatpush1.bf16.msra.mxu1 %v4931_v48  ;;  %v5005_v48 = vld [vmem:[#allocation5 + $0x1f0] ss:$24 sps:$4 sm:$0xff]  }
 0x158   :  { %2619 = vmatpush1.bf16.msra.mxu0 %v4892_v41  ;;  %2782 = vmatprep.subr.bf16.mxu1 %v4939_v51  ;;  %v4998_v41 = vld [vmem:[#allocation5 + $0x164] ss:$24 sps:$4 sm:$0xff]   ;;  %v5013_v51 = vld [vmem:[#allocation5 + $0x254] ss:$24 sps:$4 sm:$0xff]  }
 0x159   :  { %2620 = vmatprep.subr.bf16.mxu0 %v4900_v42  ;;  %v4996_v42 = vld [vmem:[#allocation5 + $0x160] ss:$24 sps:$4 sm:$0xff]  }
 0x15b   :  { %2783 = vmatpush1.bf16.msra.mxu1 %v4937_v52  ;;  %v5011_v52 = vld [vmem:[#allocation5 + $0x250] ss:$24 sps:$4 sm:$0xff]  }
 0x15c   :  { %2621 = vmatpush1.bf16.msra.mxu0 %v4898_v45  ;;  %2784 = vmatprep.subr.bf16.mxu1 %v4945_v55  ;;  %v5004_v45 = vld [vmem:[#allocation5 + $0x1c4] ss:$24 sps:$4 sm:$0xff]   ;;  %v5019_v55 = vld [vmem:[#allocation5 + $0x2b4] ss:$24 sps:$4 sm:$0xff]  }
 0x15d   :  { %2622 = vmatprep.subr.bf16.mxu0 %v4906_v46  ;;  %v5002_v46 = vld [vmem:[#allocation5 + $0x1c0] ss:$24 sps:$4 sm:$0xff]  }
 0x15f   :  { %2785 = vmatpush1.bf16.msra.mxu1 %v4943_v56  ;;  %v5017_v56 = vld [vmem:[#allocation5 + $0x2b0] ss:$24 sps:$4 sm:$0xff]  }
 0x160   :  { %2623 = vmatpush1.bf16.msra.mxu0 %v4904_v49  ;;  %2786 = vmatprep.subr.bf16.mxu1 %v4953_v59  ;;  %v5010_v49 = vld [vmem:[#allocation5 + $0x224] ss:$24 sps:$4 sm:$0xff]  }
 0x161   :  { %2624 = vmatprep.subr.bf16.mxu0 %v4912_v50  ;;  %v5008_v50 = vld [vmem:[#allocation5 + $0x220] ss:$24 sps:$4 sm:$0xff]   ;;  %v5116_v59 = vld [vmem:[#allocation8 + $0x40] sm:$0xff]  }
 0x163   :  { %2787 = vmatpush1.bf16.msra.mxu1 %v4951_v60  ;;  %v5025_v60 = vld [vmem:[#allocation5 + $0x314] ss:$24 sps:$4 sm:$0xff]  }
 0x164   :  { %2625 = vmatpush1.bf16.msra.mxu0 %v4910_v53  ;;  %2788 = vmatprep.subr.bf16.mxu1 %v4959_v0  ;;  %v5016_v53 = vld [vmem:[#allocation5 + $0x284] ss:$24 sps:$4 sm:$0xff]   ;;  %v5121_v0 = vld [vmem:[#allocation8 + $0x48] sm:$0xff]  }
 0x165   :  { %2626 = vmatprep.subr.bf16.mxu0 %v4918_v54  ;;  %v5014_v54 = vld [vmem:[#allocation5 + $0x280] ss:$24 sps:$4 sm:$0xff]  }
 0x167   :  { %2789 = vmatpush1.bf16.msra.mxu1 %v4957_v1  ;;  %v5028_v1 = vld [vmem:[#allocation5 + $0x344] ss:$24 sps:$4 sm:$0xff]  }
 0x168   :  { %2627 = vmatpush1.bf16.msra.mxu0 %v4916_v57  ;;  %2790 = vmatprep.subr.bf16.mxu1 %v4965_v6  ;;  %v5022_v57 = vld [vmem:[#allocation5 + $0x2e4] ss:$24 sps:$4 sm:$0xff]  }
 0x169   :  { %2628 = vmatprep.subr.bf16.mxu0 %v4924_v58  ;;  %v5020_v58 = vld [vmem:[#allocation5 + $0x2e0] ss:$24 sps:$4 sm:$0xff]  }
 0x16a   :  { %v5126_v6 = vld [vmem:[#allocation8 + $0x50] sm:$0xff]  }
 0x16b   :  { %2791 = vmatpush1.bf16.msra.mxu1 %v4963_v7  ;;  %v5031_v7 = vld [vmem:[#allocation5 + $0x374] ss:$24 sps:$4 sm:$0xff]  }
 0x16c   :  { %2629 = vmatpush1.bf16.msra.mxu0 %v4922_v61  ;;  %2792 = vmatprep.subr.bf16.mxu1 %v4971_v11  ;;  %v5120_v61 = vld [vmem:[#allocation8] sm:$0xff]   ;;  %v5131_v11 = vld [vmem:[#allocation8 + $0x58] sm:$0xff]  }
 0x16d   :  { %2630 = vmatprep.subr.bf16.mxu0 %v4930_v62  ;;  %v5023_v62 = vld [vmem:[#allocation5 + $0x310] ss:$24 sps:$4 sm:$0xff]  }
 0x16f   :  { %2793 = vmatpush1.bf16.msra.mxu1 %v4969_v14  ;;  %v5034_v14 = vld [vmem:[#allocation5 + $0x3a4] ss:$24 sps:$4 sm:$0xff]  }
 0x170   :  { %2631 = vmatpush1.bf16.msra.mxu0 %v4928_v2  ;;  %2794 = vmatprep.subr.bf16.mxu1 %v4977_v18  ;;  %v5125_v2 = vld [vmem:[#allocation8 + $0x8] sm:$0xff]  }
 0x171   :  { %2632 = vmatprep.subr.bf16.mxu0 %v4936_v5  ;;  %v5026_v5 = vld [vmem:[#allocation5 + $0x340] ss:$24 sps:$4 sm:$0xff]   ;;  %v5037_v18 = vld [vmem:[#allocation5 + $0x3d4] ss:$24 sps:$4 sm:$0xff]  }
 0x173   :  { %2795 = vmatpush1.bf16.msra.mxu1 %v4975_v20  ;;  %v5035_v20 = vld [vmem:[#allocation5 + $0x3d0] ss:$24 sps:$4 sm:$0xff]  }
 0x174   :  { %2633 = vmatpush1.bf16.msra.mxu0 %v4934_v8  ;;  %2796 = vmatprep.subr.bf16.mxu1 %v4983_v22  ;;  %v5130_v8 = vld [vmem:[#allocation8 + $0x10] sm:$0xff]   ;;  %v5145_v22 = vld [vmem:[#allocation8 + $0x28] sm:$0xff]  }
 0x175   :  { %2634 = vmatprep.subr.bf16.mxu0 %v4942_v10  ;;  %v5029_v10 = vld [vmem:[#allocation5 + $0x370] ss:$24 sps:$4 sm:$0xff]  }
 0x177   :  { %2797 = vmatpush1.bf16.msra.mxu1 %v4981_v23  ;;  %v5038_v23 = vld [vmem:[#allocation5 + $0x400] ss:$24 sps:$4 sm:$0xff]  }
 0x178   :  { %2635 = vmatpush1.bf16.msra.mxu0 %v4940_v15  ;;  %2798 = vmatprep.subr.bf16.mxu1 %v4989_v27  ;;  %v5135_v15 = vld [vmem:[#allocation8 + $0x18] sm:$0xff]   ;;  %v5150_v27 = vld [vmem:[#allocation8 + $0x30] sm:$0xff]  }
 0x179   :  { %2636 = vmatprep.subr.bf16.mxu0 %v4948_v16  ;;  %v5136_v16 = vld [vmem:[#allocation8 + $0x60] sm:$0xff]  }
 0x17b   :  { %2799 = vmatpush1.bf16.msra.mxu1 %v4987_v28  ;;  %v5041_v28 = vld [vmem:[#allocation5 + $0x430] ss:$24 sps:$4 sm:$0xff]  }
 0x17c   :  { %2637 = vmatpush1.bf16.msra.mxu0 %v4946_v21  ;;  %2800 = vmatprep.subr.bf16.mxu1 %v4995_v31  ;;  %v5141_v21 = vld [vmem:[#allocation8 + $0x68] sm:$0xff]   ;;  %v5155_v31 = vld [vmem:[#allocation8 + $0x38] sm:$0xff]  }
 0x17d   :  { %2811 = vmatprep.subr.bf16.mxu0 %v4956_v3  ;;  %v5040_v3 = vld [vmem:[#allocation5 + $0x404] ss:$24 sps:$4 sm:$0xff]  }
 0x17f   :  { %2639 = vmatmul.mubr.bf16.vlgmr.msra.gmra.mrb[0].mxu0 %v5662_v25  ;;  %2801 = vmatpush1.bf16.msra.mxu1 %v4993_v32  ;;  %v5044_v32 = vld [vmem:[#allocation5 + $0x460] ss:$24 sps:$4 sm:$0xff]  }
 0x180   :  { %2812 = vmatpush1.bf16.msra.mxu0 %v4954_v24  ;;  %2843 = vmatprep.mubr.bf16.mxu0 %v5616_v35  ;;  %v4992_v35 = vld [vmem:[#allocation5 + $0x134] ss:$24 sps:$4 sm:$0xff]  }
 0x181   :  { %2813 = vmatprep.subr.bf16.mxu0 %v4962_v26  ;;  %4462 = vmatprep.subr.bf16.mxu1 %v5116_v59  ;;  %v5146_v24 = vld [vmem:[#allocation8 + $0x70] sm:$0xff]  }
 0x182   :  { %2803 = vmatmul.mubr.bf16.vlgmr.msra.gmra.mrb[0].mxu1 %v5662_v25  ;;  %v5043_v26 = vld [vmem:[#allocation5 + $0x434] ss:$24 sps:$4 sm:$0xff]   ;;  %v5088_v59 = vld [vmem:[#allocation5 + $0x704] ss:$24 sps:$4 sm:$0xff]  }
 0x183   :  { %4463 = vmatpush3.bf16.msra.mxu1 %v5120_v61  ;;  %v5094_v61 = vld [vmem:[#allocation5 + $0x764] ss:$24 sps:$4 sm:$0xff]  }
 0x184   :  { %2814 = vmatpush1.bf16.msra.mxu0 %v4960_v29  ;;  %4464 = vmatprep.subr.bf16.mxu1 %v5121_v0  ;;  %v5151_v29 = vld [vmem:[#allocation8 + $0x78] sm:$0xff]   ;;  %v5097_v0 = vld [vmem:[#allocation5 + $0x794] ss:$24 sps:$4 sm:$0xff]  }
 0x185   :  { %2815 = vmatprep.subr.bf16.mxu0 %v4968_v30  ;;  %v5046_v30 = vld [vmem:[#allocation5 + $0x464] ss:$24 sps:$4 sm:$0xff]  }
 0x187   :  { %4465 = vmatpush3.bf16.msra.mxu1 %v5125_v2  ;;  %v5100_v2 = vld [vmem:[#allocation5 + $0x7c4] ss:$24 sps:$4 sm:$0xff]  }
 0x188   :  { %2816 = vmatpush1.bf16.msra.mxu0 %v4966_v12  ;;  %4466 = vmatprep.subr.bf16.mxu1 %v5126_v6  ;;  %v5156_v12 = vld [vmem:[#allocation8 + $0xc0] sm:$0xff]  }
 0x189   :  { %2817 = vmatprep.subr.bf16.mxu0 %v4974_v33  ;;  %v5049_v33 = vld [vmem:[#allocation5 + $0x494] ss:$24 sps:$4 sm:$0xff]  }
 0x18a   :  { %v5103_v6 = vld [vmem:[#allocation5 + $0x7f4] ss:$24 sps:$4 sm:$0xff]  }
 0x18b   :  { %4467 = vmatpush3.bf16.msra.mxu1 %v5130_v8  ;;  %v5106_v8 = vld [vmem:[#allocation5 + $0x824] ss:$24 sps:$4 sm:$0xff]  }
 0x18c   :  { %2818 = vmatpush1.bf16.msra.mxu0 %v4972_v34  ;;  %4468 = vmatprep.subr.bf16.mxu1 %v5131_v11  ;;  %v5047_v34 = vld [vmem:[#allocation5 + $0x490] ss:$24 sps:$4 sm:$0xff]   ;;  %v5109_v11 = vld [vmem:[#allocation5 + $0x854] ss:$24 sps:$4 sm:$0xff]  }
 0x18d   :  { %2819 = vmatprep.subr.bf16.mxu0 %v4980_v36  ;;  %v5052_v36 = vld [vmem:[#allocation5 + $0x4c4] ss:$24 sps:$4 sm:$0xff]  }
 0x18f   :  { %4469 = vmatpush3.bf16.msra.mxu1 %v5135_v15  ;;  %v5112_v15 = vld [vmem:[#allocation5 + $0x884] ss:$24 sps:$4 sm:$0xff]  }
 0x190   :  { %2820 = vmatpush1.bf16.msra.mxu0 %v4978_v37  ;;  %4470 = vmatprep.subr.bf16.mxu1 %v5136_v16  ;;  %v5050_v37 = vld [vmem:[#allocation5 + $0x4c0] ss:$24 sps:$4 sm:$0xff]   ;;  %v5115_v16 = vld [vmem:[#allocation5 + $0x8b4] ss:$24 sps:$4 sm:$0xff]  }
 0x191   :  { %2821 = vmatprep.subr.bf16.mxu0 %v4986_v38  ;;  %v5055_v38 = vld [vmem:[#allocation5 + $0x4f4] ss:$24 sps:$4 sm:$0xff]  }
 0x194   :  { %2822 = vmatpush1.bf16.msra.mxu0 %v4984_v39  ;;  %v5053_v39 = vld [vmem:[#allocation5 + $0x4f0] ss:$24 sps:$4 sm:$0xff]  }
 0x195   :  { %2823 = vmatprep.subr.bf16.mxu0 %v4992_v35  ;;  %v5058_v35 = vld [vmem:[#allocation5 + $0x524] ss:$24 sps:$4 sm:$0xff]  }
 0x198   :  { %2824 = vmatpush1.bf16.msra.mxu0 %v4990_v40  ;;  %v5056_v40 = vld [vmem:[#allocation5 + $0x520] ss:$24 sps:$4 sm:$0xff]  }
 0x199   :  { %2825 = vmatprep.subr.bf16.mxu0 %v4998_v41  ;;  %v5061_v41 = vld [vmem:[#allocation5 + $0x554] ss:$24 sps:$4 sm:$0xff]  }
 0x19c   :  { %2826 = vmatpush1.bf16.msra.mxu0 %v4996_v42  ;;  %v5059_v42 = vld [vmem:[#allocation5 + $0x550] ss:$24 sps:$4 sm:$0xff]  }
 0x19d   :  { %2827 = vmatprep.subr.bf16.mxu0 %v5001_v43  ;;  %v5064_v43 = vld [vmem:[#allocation5 + $0x584] ss:$24 sps:$4 sm:$0xff]  }
 0x1a0   :  { %2828 = vmatpush1.bf16.msra.mxu0 %v4999_v44  ;;  %v5062_v44 = vld [vmem:[#allocation5 + $0x580] ss:$24 sps:$4 sm:$0xff]  }
 0x1a1   :  { %2829 = vmatprep.subr.bf16.mxu0 %v5004_v45  ;;  %v5067_v45 = vld [vmem:[#allocation5 + $0x5b4] ss:$24 sps:$4 sm:$0xff]  }
 0x1a4   :  { %2830 = vmatpush1.bf16.msra.mxu0 %v5002_v46  ;;  %v5065_v46 = vld [vmem:[#allocation5 + $0x5b0] ss:$24 sps:$4 sm:$0xff]  }
 0x1a5   :  { %2831 = vmatprep.subr.bf16.mxu0 %v5007_v47  ;;  %v5070_v47 = vld [vmem:[#allocation5 + $0x5e4] ss:$24 sps:$4 sm:$0xff]  }
 0x1a8   :  { %2832 = vmatpush1.bf16.msra.mxu0 %v5005_v48  ;;  %v5068_v48 = vld [vmem:[#allocation5 + $0x5e0] ss:$24 sps:$4 sm:$0xff]  }
 0x1a9   :  { %2833 = vmatprep.subr.bf16.mxu0 %v5010_v49  ;;  %v5073_v49 = vld [vmem:[#allocation5 + $0x614] ss:$24 sps:$4 sm:$0xff]  }
 0x1ac   :  { %2834 = vmatpush1.bf16.msra.mxu0 %v5008_v50  ;;  %v5071_v50 = vld [vmem:[#allocation5 + $0x610] ss:$24 sps:$4 sm:$0xff]  }
 0x1ad   :  { %2835 = vmatprep.subr.bf16.mxu0 %v5013_v51  ;;  %v5076_v51 = vld [vmem:[#allocation5 + $0x644] ss:$24 sps:$4 sm:$0xff]  }
 0x1b0   :  { %2836 = vmatpush1.bf16.msra.mxu0 %v5011_v52  ;;  %v5074_v52 = vld [vmem:[#allocation5 + $0x640] ss:$24 sps:$4 sm:$0xff]  }
 0x1b1   :  { %2837 = vmatprep.subr.bf16.mxu0 %v5016_v53  ;;  %v5079_v53 = vld [vmem:[#allocation5 + $0x674] ss:$24 sps:$4 sm:$0xff]  }
 0x1b4   :  { %2838 = vmatpush1.bf16.msra.mxu0 %v5014_v54  ;;  %v5077_v54 = vld [vmem:[#allocation5 + $0x670] ss:$24 sps:$4 sm:$0xff]  }
 0x1b5   :  { %2839 = vmatprep.subr.bf16.mxu0 %v5019_v55  ;;  %v5082_v55 = vld [vmem:[#allocation5 + $0x6a4] ss:$24 sps:$4 sm:$0xff]  }
 0x1b8   :  { %2840 = vmatpush1.bf16.msra.mxu0 %v5017_v56  ;;  %v5080_v56 = vld [vmem:[#allocation5 + $0x6a0] ss:$24 sps:$4 sm:$0xff]  }
 0x1b9   :  { %2841 = vmatprep.subr.bf16.mxu0 %v5022_v57  ;;  %v5085_v57 = vld [vmem:[#allocation5 + $0x6d4] ss:$24 sps:$4 sm:$0xff]  }
 0x1bc   :  { %2842 = vmatpush1.bf16.msra.mxu0 %v5020_v58  ;;  %v5083_v58 = vld [vmem:[#allocation5 + $0x6d0] ss:$24 sps:$4 sm:$0xff]  }
 0x1bd   :  { %2852 = vmatprep.subr.bf16.mxu0 %v5025_v60  ;;  %v5091_v60 = vld [vmem:[#allocation5 + $0x734] ss:$24 sps:$4 sm:$0xff]  }
 0x1bf   :  { %2844 = vmatmul.mubr.bf16.vlgmr.msra.gmra.mrb[4].mxu0 %v5620_v63  ;;  %v5032_v63 = vld [vmem:[#allocation5 + $0x3a0] ss:$24 sps:$4 sm:$0xff]  }
 0x1c0   :  { %2853 = vmatpush1.bf16.msra.mxu0 %v5023_v62  ;;  %2884 = vmatprep.mubr.bf16.mxu0 %v5628_v17  ;;  %v5140_v17 = vld [vmem:[#allocation8 + $0x20] sm:$0xff]   ;;  %v5092_v62 = vld [vmem:[#allocation5 + $0x760] ss:$24 sps:$4 sm:$0xff]  }
 0x1c1   :  { %2854 = vmatprep.subr.bf16.mxu0 %v5028_v1  ;;  %4471 = vmatpush3.bf16.msra.mxu1 %v5140_v17  ;;  %v5095_v1 = vld [vmem:[#allocation5 + $0x790] ss:$24 sps:$4 sm:$0xff]   ;;  %v5119_v17 = vld [vmem:[#allocation5 + $0x8e4] ss:$24 sps:$4 sm:$0xff]  }
 0x1c2   :  { %4472 = vmatprep.subr.bf16.mxu1 %v5141_v21  ;;  %v5124_v21 = vld [vmem:[#allocation5 + $0x914] ss:$24 sps:$4 sm:$0xff]  }
 0x1c4   :  { %2855 = vmatpush1.bf16.msra.mxu0 %v5026_v5  ;;  %v5098_v5 = vld [vmem:[#allocation5 + $0x7c0] ss:$24 sps:$4 sm:$0xff]  }
 0x1c5   :  { %2856 = vmatprep.subr.bf16.mxu0 %v5031_v7  ;;  %4473 = vmatpush3.bf16.msra.mxu1 %v5145_v22  ;;  %v5101_v7 = vld [vmem:[#allocation5 + $0x7f0] ss:$24 sps:$4 sm:$0xff]   ;;  %v5129_v22 = vld [vmem:[#allocation5 + $0x944] ss:$24 sps:$4 sm:$0xff]  }
 0x1c6   :  { %4474 = vmatprep.subr.bf16.mxu1 %v5146_v24  ;;  %v5134_v24 = vld [vmem:[#allocation5 + $0x974] ss:$24 sps:$4 sm:$0xff]  }
 0x1c8   :  { %2857 = vmatpush1.bf16.msra.mxu0 %v5029_v10  ;;  %v5104_v10 = vld [vmem:[#allocation5 + $0x820] ss:$24 sps:$4 sm:$0xff]  }
 0x1c9   :  { %2858 = vmatprep.subr.bf16.mxu0 %v5034_v14  ;;  %4475 = vmatpush3.bf16.msra.mxu1 %v5150_v27  ;;  %v5107_v14 = vld [vmem:[#allocation5 + $0x850] ss:$24 sps:$4 sm:$0xff]  }
 0x1ca   :  { %4476 = vmatprep.subr.bf16.mxu1 %v5151_v29  ;;  %v5132_v27 = vld [vmem:[#allocation5 + $0x970] ss:$24 sps:$4 sm:$0xff]  }
 0x1cc   :  { %2859 = vmatpush1.bf16.msra.mxu0 %v5032_v63  ;;  %v5110_v63 = vld [vmem:[#allocation5 + $0x880] ss:$24 sps:$4 sm:$0xff]  }
 0x1cd   :  { %2860 = vmatprep.subr.bf16.mxu0 %v5037_v18  ;;  %4477 = vmatpush3.bf16.msra.mxu1 %v5155_v31  ;;  %v5113_v18 = vld [vmem:[#allocation5 + $0x8b0] ss:$24 sps:$4 sm:$0xff]   ;;  %v5144_v31 = vld [vmem:[#allocation5 + $0x9d4] ss:$24 sps:$4 sm:$0xff]  }
 0x1ce   :  { %4484 = vmatprep.subr.bf16.mxu1 %v5156_v12  ;;  %v5676_v12 = vld [vmem:[#allocation7] sm:$0x3f] }
 0x1d0   :  { %2861 = vmatpush1.bf16.msra.mxu0 %v5035_v20  ;;  %v5117_v20 = vld [vmem:[#allocation5 + $0x8e0] ss:$24 sps:$4 sm:$0xff]  }
 0x1d1   :  { %2862 = vmatprep.subr.bf16.mxu0 %v5040_v3  ;;  %v5122_v3 = vld [vmem:[#allocation5 + $0x910] ss:$24 sps:$4 sm:$0xff]  }
 0x1d4   :  { %2863 = vmatpush1.bf16.msra.mxu0 %v5038_v23  ;;  %v5127_v23 = vld [vmem:[#allocation5 + $0x940] ss:$24 sps:$4 sm:$0xff]  }
 0x1d5   :  { %2864 = vmatprep.subr.bf16.mxu0 %v5043_v26  ;;  %v505_v26 = vlaneseq }
 0x1d7   :  { %v5673_v29 = vshrl.u32 %v505_v26, 7  ;;  %v5187_v26 = vld [vmem:[#allocation5 + $0xb80] ss:$24 sps:$4 sm:$0xff]  }
 0x1d8   :  { %2865 = vmatpush1.bf16.msra.mxu0 %v5041_v28  ;;  %v5139_v28 = vld [vmem:[#allocation5 + $0x9a4] ss:$24 sps:$4 sm:$0xff]  }
 0x1d9   :  { %2866 = vmatprep.subr.bf16.mxu0 %v5046_v30  ;;  %v5137_v30 = vld [vmem:[#allocation5 + $0x9a0] ss:$24 sps:$4 sm:$0xff]  }
 0x1dc   :  { %2867 = vmatpush1.bf16.msra.mxu0 %v5044_v32  ;;  %v507_v32 = vsub.s32 0, %v5673_v29 }
 0x1dd   :  { %2868 = vmatprep.subr.bf16.mxu0 %v5049_v33  ;;  %v5149_v33 = vld [vmem:[#allocation5 + $0xa04] ss:$24 sps:$4 sm:$0xff]  }
 0x1e0   :  { %2869 = vmatpush1.bf16.msra.mxu0 %v5047_v34  ;;  %v508_v34 = vrot.slane %v5676_v12, %v507_v32 }
 0x1e1   :  { %2870 = vmatprep.subr.bf16.mxu0 %v5052_v36 }
 0x1e4   :  { %2871 = vmatpush1.bf16.msra.mxu0 %v5050_v37  ;;  %v5147_v37 = vld [vmem:[#allocation5 + $0xa00] ss:$24 sps:$4 sm:$0xff]  }
 0x1e5   :  { %2872 = vmatprep.subr.bf16.mxu0 %v5055_v38  ;;  %v5154_v38 = vld [vmem:[#allocation5 + $0xa34] ss:$24 sps:$4 sm:$0xff]  }
 0x1e8   :  { %2873 = vmatpush1.bf16.msra.mxu0 %v5053_v39 }
 0x1e9   :  { %2874 = vmatprep.subr.bf16.mxu0 %v5058_v35 }
 0x1ec   :  { %2875 = vmatpush1.bf16.msra.mxu0 %v5056_v40 }
 0x1ed   :  { %2876 = vmatprep.subr.bf16.mxu0 %v5061_v41 }
 0x1f0   :  { %2877 = vmatpush1.bf16.msra.mxu0 %v5059_v42 }
 0x1f1   :  { %2878 = vmatprep.subr.bf16.mxu0 %v5064_v43  ;;  %v5152_v43 = vld [vmem:[#allocation5 + $0xa30] ss:$24 sps:$4 sm:$0xff]  }
 0x1f4   :  { %2879 = vmatpush1.bf16.msra.mxu0 %v5062_v44 }
 0x1f5   :  { %2880 = vmatprep.subr.bf16.mxu0 %v5067_v45 }
 0x1f8   :  { %2881 = vmatpush1.bf16.msra.mxu0 %v5065_v46  ;;  %v5159_v46 = vld [vmem:[#allocation5 + $0xa64] ss:$24 sps:$4 sm:$0xff]  }
 0x1f9   :  { %2882 = vmatprep.subr.bf16.mxu0 %v5070_v47 }
 0x1fc   :  { %2883 = vmatpush1.bf16.msra.mxu0 %v5068_v48  ;;  %v519_v48 = vsub.s32 3, %v5673_v29 }
 0x1fd   :  { %2893 = vmatprep.subr.bf16.mxu0 %v5073_v49 }
 0x1ff   :  { %2885 = vmatmul.mubr.bf16.vlgmr.msra.gmra.mrb[4].mxu0 %v5636_v4  ;;  %v5086_v4 = vld [vmem:[#allocation5 + $0x700] ss:$24 sps:$4 sm:$0xff]  }
 0x200   :  { %2894 = vmatpush1.bf16.msra.mxu0 %v5071_v50  ;;  %2925 = vmatprep.mubr.bf16.mxu0 %v5640_v9  ;;  %v5089_v9 = vld [vmem:[#allocation5 + $0x730] ss:$24 sps:$4 sm:$0xff]   ;;  %v5157_v50 = vld [vmem:[#allocation5 + $0xa60] ss:$24 sps:$4 sm:$0xff]  }
 0x201   :  { %2895 = vmatprep.subr.bf16.mxu0 %v5076_v51  ;;  %v5160_v51 = vld [vmem:[#allocation8 + $0x80] sm:$0xff]  }
 0x204   :  { %2896 = vmatpush1.bf16.msra.mxu0 %v5074_v52 }
 0x205   :  { %2897 = vmatprep.subr.bf16.mxu0 %v5079_v53  ;;  %v5161_v53 = vld [vmem:[#allocation8 + $0xc8] sm:$0xff]  }
 0x208   :  { %2898 = vmatpush1.bf16.msra.mxu0 %v5077_v54  ;;  %v5164_v54 = vld [vmem:[#allocation5 + $0xa94] ss:$24 sps:$4 sm:$0xff]  }
 0x209   :  { %2899 = vmatprep.subr.bf16.mxu0 %v5082_v55  ;;  %v520_v55 = vrot.slane %v5676_v12, %v519_v48 }
 0x20c   :  { %2900 = vmatpush1.bf16.msra.mxu0 %v5080_v56  ;;  %v5162_v56 = vld [vmem:[#allocation5 + $0xa90] ss:$24 sps:$4 sm:$0xff]  }
 0x20d   :  { %2901 = vmatprep.subr.bf16.mxu0 %v5085_v57  ;;  %v5165_v57 = vld [vmem:[#allocation8 + $0x88] sm:$0xff]  }
 0x210   :  { %2902 = vmatpush1.bf16.msra.mxu0 %v5083_v58  ;;  %v5166_v58 = vld [vmem:[#allocation8 + $0xd0] sm:$0xff]  }
 0x211   :  { %2903 = vmatprep.subr.bf16.mxu0 %v5088_v59  ;;  %v5169_v59 = vld [vmem:[#allocation5 + $0xac4] ss:$24 sps:$4 sm:$0xff]  }
 0x214   :  { %2904 = vmatpush1.bf16.msra.mxu0 %v5086_v4 }
 0x215   :  { %2905 = vmatprep.subr.bf16.mxu0 %v5091_v60 }
 0x218   :  { %2906 = vmatpush1.bf16.msra.mxu0 %v5089_v9 }
 0x219   :  { %2907 = vmatprep.subr.bf16.mxu0 %v5094_v61 }
 0x21c   :  { %2908 = vmatpush1.bf16.msra.mxu0 %v5092_v62  ;;  %v5167_v62 = vld [vmem:[#allocation5 + $0xac0] ss:$24 sps:$4 sm:$0xff]  }
 0x21d   :  { %2909 = vmatprep.subr.bf16.mxu0 %v5097_v0  ;;  %v5170_v0 = vld [vmem:[#allocation8 + $0x90] sm:$0xff]  }
 0x220   :  { %2910 = vmatpush1.bf16.msra.mxu0 %v5095_v1 }
 0x221   :  { %2911 = vmatprep.subr.bf16.mxu0 %v5100_v2  ;;  %v5171_v2 = vld [vmem:[#allocation8 + $0xd8] sm:$0xff]  }
 0x224   :  { %2912 = vmatpush1.bf16.msra.mxu0 %v5098_v5  ;;  %v5174_v5 = vld [vmem:[#allocation5 + $0xaf4] ss:$24 sps:$4 sm:$0xff]  }
 0x225   :  { %2913 = vmatprep.subr.bf16.mxu0 %v5103_v6 }
 0x228   :  { %2914 = vmatpush1.bf16.msra.mxu0 %v5101_v7 }
 0x229   :  { %2915 = vmatprep.subr.bf16.mxu0 %v5106_v8  ;;  %v5172_v8 = vld [vmem:[#allocation5 + $0xaf0] ss:$24 sps:$4 sm:$0xff]  }
 0x22c   :  { %2916 = vmatpush1.bf16.msra.mxu0 %v5104_v10  ;;  %v5175_v10 = vld [vmem:[#allocation8 + $0x98] sm:$0xff]  }
 0x22d   :  { %2917 = vmatprep.subr.bf16.mxu0 %v5109_v11  ;;  %v5176_v11 = vld [vmem:[#allocation8 + $0xe0] sm:$0xff]  }
 0x230   :  { %2918 = vmatpush1.bf16.msra.mxu0 %v5107_v14  ;;  %v5179_v14 = vld [vmem:[#allocation5 + $0xb24] ss:$24 sps:$4 sm:$0xff]  }
 0x231   :  { %2919 = vmatprep.subr.bf16.mxu0 %v5112_v15  ;;  %v515_v15 = vsub.s32 2, %v5673_v29 }
 0x234   :  { %2920 = vmatpush1.bf16.msra.mxu0 %v5110_v63  ;;  %v5177_v63 = vld [vmem:[#allocation5 + $0xb20] ss:$24 sps:$4 sm:$0xff]  }
 0x235   :  { %2921 = vmatprep.subr.bf16.mxu0 %v5115_v16  ;;  %v5180_v16 = vld [vmem:[#allocation8 + $0xa0] sm:$0xff]  }
 0x238   :  { %2922 = vmatpush1.bf16.msra.mxu0 %v5113_v18  ;;  %v5181_v18 = vld [vmem:[#allocation8 + $0xe8] sm:$0xff]  }
 0x239   :  { %2923 = vmatprep.subr.bf16.mxu0 %v5119_v17  ;;  %v5184_v17 = vld [vmem:[#allocation5 + $0xb54] ss:$24 sps:$4 sm:$0xff]  }
 0x23c   :  { %2924 = vmatpush1.bf16.msra.mxu0 %v5117_v20  ;;  %v516_v20 = vrot.slane %v5676_v12, %v515_v15 }
 0x23d   :  { %2934 = vmatprep.subr.bf16.mxu0 %v5124_v21  ;;  %v5182_v21 = vld [vmem:[#allocation5 + $0xb50] ss:$24 sps:$4 sm:$0xff]  }
 0x23f   :  { %2926 = vmatmul.mubr.bf16.vlgmr.msra.gmra.mrb[4].mxu0 %v5650_v13  ;;  %v5142_v13 = vld [vmem:[#allocation5 + $0x9d0] ss:$24 sps:$4 sm:$0xff]  }
 0x240   :  { %2935 = vmatpush1.bf16.msra.mxu0 %v5122_v3  ;;  %2966 = vmatprep.mubr.bf16.mxu0 %v5654_v19  ;;  %v511_v19 = vsub.s32 1, %v5673_v29  ;;  %v5185_v3 = vld [vmem:[#allocation8 + $0xa8] sm:$0xff]  }
 0x241   :  { %2936 = vmatprep.subr.bf16.mxu0 %v5129_v22  ;;  %v5186_v22 = vld [vmem:[#allocation8 + $0xf0] sm:$0xff]  }
 0x242   :  { %v512_v36 = vrot.slane %v5676_v12, %v511_v19 }
 0x244   :  { %2937 = vmatpush1.bf16.msra.mxu0 %v5127_v23  ;;  %v5189_v23 = vld [vmem:[#allocation5 + $0xb84] ss:$24 sps:$4 sm:$0xff]  }
 0x245   :  { %2938 = vmatprep.subr.bf16.mxu0 %v5134_v24 }
 0x248   :  { %2939 = vmatpush1.bf16.msra.mxu0 %v5132_v27  ;;  %v5190_v27 = vld [vmem:[#allocation8 + $0xb0] sm:$0xff]  }
 0x249   :  { %2940 = vmatprep.subr.bf16.mxu0 %v5139_v28  ;;  %v5191_v28 = vld [vmem:[#allocation8 + $0xf8] sm:$0xff]  }
 0x24c   :  { %2941 = vmatpush1.bf16.msra.mxu0 %v5137_v30  ;;  %v5194_v30 = vld [vmem:[#allocation5 + $0xbb4] ss:$24 sps:$4 sm:$0xff]  }
 0x24d   :  { %2942 = vmatprep.subr.bf16.mxu0 %v5144_v31 }
 0x250   :  { %2943 = vmatpush1.bf16.msra.mxu0 %v5142_v13  ;;  %v5192_v13 = vld [vmem:[#allocation5 + $0xbb0] ss:$24 sps:$4 sm:$0xff]  }
 0x251   :  { %2944 = vmatprep.subr.bf16.mxu0 %v5149_v33  ;;  %v5195_v33 = vld [vmem:[#allocation8 + $0xb8] sm:$0xff]  }
 0x252   :  { %v2640_v39 = vpop.f32.mrb[0].mxu0 }
 0x253   :  { %v4528_v35 = vadd.f32 %v2640_v39, %v508_v34  ;;  %v2642_v40 = vpop.f32.mrb[1].mxu0  ;;  %v5198_v34 = vld [vmem:[#allocation5 + $0xbe4] ss:$24 sps:$4 sm:$0xff]  }
 0x254   :  { %v4529_v41 = vadd.f32 %v2642_v40, %v512_v36  ;;  %v2644_v42 = vpop.f32.mrb[2].mxu0  ;;  %2945 = vmatpush1.bf16.msra.mxu0 %v5147_v37  ;;  %v5196_v37 = vld [vmem:[#allocation5 + $0xbe0] ss:$24 sps:$4 sm:$0xff]   ;;  %v5200_v39 = vld [vmem:[#allocation8 + $0x100] sm:$0xff]   ;;  %v5202_v40 = vld [vmem:[#allocation8 + $0x108] sm:$0xff]  }
 0x255   :  { %v2975_v44 = vmax.f32 %v4528_v35, 0.0  ;;  %v2645_v45 = vpop.f32.mrb[3].mxu0  ;;  %2946 = vmatprep.subr.bf16.mxu0 %v5154_v38  ;;  %v2804_v4 = vpop.f32.mrb[0].mxu1  ;;  %v5199_v38 = vld [vmem:[#allocation8 + $0x140] sm:$0xff]   ;;  %v5201_v35 = vld [vmem:[#allocation8 + $0x148] sm:$0xff]   ;;  %v5204_v42 = vld [vmem:[#allocation8 + $0x110] sm:$0xff]  }
 0x256   :  { %v2976_v47 = vmax.f32 %v4529_v41, 0.0  ;;  %v2806_v60 = vpop.f32.mrb[1].mxu1  ;;  %v4530_v24 = vadd.f32 %v2804_v4, %v516_v20  ;;  %v5203_v41 = vld [vmem:[#allocation8 + $0x150] sm:$0xff]   ;;  %v5207_v45 = vld [vmem:[#allocation8 + $0x160] sm:$0xff]   ;;  %v527_v4 = vsub.s32 5, %v5673_v29 }
 0x257   :  { %v2981_v52 = vpack.c.bf16 %v2975_v44, %v2975_v44  ;;  %v4531_v9 = vadd.f32 %v2806_v60, %v520_v55  ;;  %v2808_v61 = vpop.f32.mrb[2].mxu1  ;;  %v5206_v44 = vld [vmem:[#allocation8 + $0x118] sm:$0xff]   ;;  %v4365_v60 = vld [vmem:[#allocation10] ss:$0 sm:$0xff] }
 0x258   :  { %v2982_v49 = vpack.c.bf16 %v2976_v47, %v2976_v47  ;;  %2947 = vmatpush1.bf16.msra.mxu0 %v5152_v43  ;;  %v2809_v1 = vpop.f32.mrb[3].mxu1  ;;  %v2977_v31 = vmax.f32 %v4530_v24, 0.0  ;;  %v5205_v43 = vld [vmem:[#allocation8 + $0x158] sm:$0xff]   ;;  %v5210_v47 = vld [vmem:[#allocation8 + $0x128] sm:$0xff]  }
 0x259   :  { %2948 = vmatprep.subr.bf16.mxu0 %v5159_v46  ;;  %v2978_v6 = vmax.f32 %v4531_v9, 0.0  ;;  %v5208_v46 = vld [vmem:[#allocation8 + $0x120] sm:$0xff]  }
 0x25a   :  { %3410 = vmatprep.mubr.bf16.mxu1 %v2982_v49  ;;  %v2983_v36 = vpack.c.bf16 %v2977_v31, %v2977_v31  ;;  %v5211_v49 = vld [vmem:[#allocation8 + $0x170] sm:$0xff]   ;;  %v5221_v24 = vld [vmem:[#allocation11 + $0x60] ss:$24 sps:$4 sm:$0xff]  }
 0x25b   :  { %3411 = vmatmul.mubr.bf16.vlgmr.msra.gmra.mrb[4].mxu1 %v2981_v52  ;;  %v2984_v7 = vpack.c.bf16 %v2978_v6, %v2978_v6  ;;  %v5214_v52 = vld [vmem:[#allocation8 + $0x138] sm:$0xff]  }
 0x25c   :  { %4485 = vmatpush3.bf16.msra.mxu1 %v5160_v51  ;;  %2949 = vmatpush1.bf16.msra.mxu0 %v5157_v50  ;;  %v5212_v50 = vld [vmem:[#allocation8 + $0x130] sm:$0xff]   ;;  %v5213_v51 = vld [vmem:[#allocation8 + $0x178] sm:$0xff]  }
 0x25d   :  { %4486 = vmatprep.subr.bf16.mxu1 %v5161_v53  ;;  %2950 = vmatprep.subr.bf16.mxu0 %v5164_v54  ;;  %v5217_v53 = vld [vmem:[#allocation11 + $0x4] ss:$24 sps:$4 sm:$0xff]   ;;  %v5232_v31 = vld [vmem:[#allocation11 + $0xf4] ss:$24 sps:$4 sm:$0xff]  }
 0x25e   :  { %3450 = vmatprep.mubr.bf16.mxu1 %v2984_v7 }
 0x260   :  { %4487 = vmatpush3.bf16.msra.mxu1 %v5165_v57  ;;  %2951 = vmatpush1.bf16.msra.mxu0 %v5162_v56 }
 0x261   :  { %4488 = vmatprep.subr.bf16.mxu1 %v5166_v58  ;;  %2952 = vmatprep.subr.bf16.mxu0 %v5169_v59  ;;  %v523_v59 = vsub.s32 4, %v5673_v29 }
 0x264   :  { %4489 = vmatpush3.bf16.msra.mxu1 %v5170_v0  ;;  %2953 = vmatpush1.bf16.msra.mxu0 %v5167_v62  ;;  %v524_v62 = vrot.slane %v5676_v12, %v523_v59 }
 0x265   :  { %4490 = vmatprep.subr.bf16.mxu1 %v5171_v2  ;;  %2954 = vmatprep.subr.bf16.mxu0 %v5174_v5  ;;  %v528_v5 = vrot.slane %v5676_v12, %v527_v4  ;;  %v5223_v12 = vld [vmem:[#allocation11 + $0x64] ss:$24 sps:$4 sm:$0xff]  }
 0x268   :  { %4491 = vmatpush3.bf16.msra.mxu1 %v5175_v10  ;;  %2955 = vmatpush1.bf16.msra.mxu0 %v5172_v8 }
 0x269   :  { %4492 = vmatprep.subr.bf16.mxu1 %v5176_v11  ;;  %2956 = vmatprep.subr.bf16.mxu0 %v5179_v14 }
 0x26c   :  { %4493 = vmatpush3.bf16.msra.mxu1 %v5180_v16  ;;  %2957 = vmatpush1.bf16.msra.mxu0 %v5177_v63 }
 0x26d   :  { %4494 = vmatprep.subr.bf16.mxu1 %v5181_v18  ;;  %2958 = vmatprep.subr.bf16.mxu0 %v5184_v17 }
 0x270   :  { %4495 = vmatpush3.bf16.msra.mxu1 %v5185_v3  ;;  %2959 = vmatpush1.bf16.msra.mxu0 %v5182_v21  ;;  %v5215_v21 = vld [vmem:[#allocation11] ss:$24 sps:$4 sm:$0xff]  }
 0x271   :  { %4496 = vmatprep.subr.bf16.mxu1 %v5186_v22  ;;  %2960 = vmatprep.subr.bf16.mxu0 %v5189_v23  ;;  %v5220_v22 = vld [vmem:[#allocation11 + $0x34] ss:$24 sps:$4 sm:$0xff]   ;;  %v5218_v23 = vld [vmem:[#allocation11 + $0x30] ss:$24 sps:$4 sm:$0xff]  }
 0x274   :  { %4497 = vmatpush3.bf16.msra.mxu1 %v5190_v27  ;;  %2961 = vmatpush1.bf16.msra.mxu0 %v5187_v26  ;;  %v5226_v26 = vld [vmem:[#allocation11 + $0x94] ss:$24 sps:$4 sm:$0xff]   ;;  %v5224_v27 = vld [vmem:[#allocation11 + $0x90] ss:$24 sps:$4 sm:$0xff]  }
 0x275   :  { %4498 = vmatprep.subr.bf16.mxu1 %v5191_v28  ;;  %2962 = vmatprep.subr.bf16.mxu0 %v5194_v30  ;;  %v5229_v28 = vld [vmem:[#allocation11 + $0xc4] ss:$24 sps:$4 sm:$0xff]   ;;  %v5227_v30 = vld [vmem:[#allocation11 + $0xc0] ss:$24 sps:$4 sm:$0xff]  }
 0x278   :  { %4499 = vmatpush3.bf16.msra.mxu1 %v5195_v33  ;;  %2963 = vmatpush1.bf16.msra.mxu0 %v5192_v13  ;;  %v5230_v13 = vld [vmem:[#allocation11 + $0xf0] ss:$24 sps:$4 sm:$0xff]   ;;  %v5235_v33 = vld [vmem:[#allocation11 + $0x124] ss:$24 sps:$4 sm:$0xff]  }
 0x279   :  { %2964 = vmatprep.subr.bf16.mxu0 %v5198_v34  ;;  %4506 = vmatprep.subr.bf16.mxu1 %v5199_v38  ;;  %v5233_v34 = vld [vmem:[#allocation11 + $0x120] ss:$24 sps:$4 sm:$0xff]   ;;  %v5241_v38 = vld [vmem:[#allocation11 + $0xc] ss:$24 sps:$4 sm:$0xff]  }
 0x27b   :  { %3451 = vmatmul.mubr.bf16.vlgmr.msra.gmra.mrb[8].mxu1 %v2983_v36  ;;  %v5238_v36 = vld [vmem:[#allocation11 + $0x154] ss:$24 sps:$4 sm:$0xff]  }
 0x27c   :  { %2965 = vmatpush1.bf16.msra.mxu0 %v5196_v37  ;;  %4507 = vmatpush3.bf16.msra.mxu1 %v5200_v39  ;;  %v5236_v37 = vld [vmem:[#allocation11 + $0x150] ss:$24 sps:$4 sm:$0xff]   ;;  %v5484_v39 = vmov 0  }
 0x27d   :  { %4508 = vmatprep.subr.bf16.mxu1 %v5201_v35 }
 0x27f   :  { %2967 = vmatmul.mubr.bf16.vlgmr.msra.gmra.mrb[4].mxu0 %v5662_v25  ;;  %v5209_v25 = vld [vmem:[#allocation8 + $0x168] sm:$0xff]  }
 0x280   :  { %4509 = vmatpush3.bf16.msra.mxu1 %v5202_v40 }
 0x281   :  { %4510 = vmatprep.subr.bf16.mxu1 %v5203_v41 }
 0x284   :  { %4511 = vmatpush3.bf16.msra.mxu1 %v5204_v42 }
 0x285   :  { %4512 = vmatprep.subr.bf16.mxu1 %v5205_v43 }
 0x288   :  { %4513 = vmatpush3.bf16.msra.mxu1 %v5206_v44 }
 0x289   :  { %4514 = vmatprep.subr.bf16.mxu1 %v5207_v45 }
 0x28c   :  { %4515 = vmatpush3.bf16.msra.mxu1 %v5208_v46  ;;  %v5239_v46 = vld [vmem:[#allocation11 + $0x8] ss:$24 sps:$4 sm:$0xff]  }
 0x28d   :  { %4516 = vmatprep.subr.bf16.mxu1 %v5209_v25 }
 0x290   :  { %4517 = vmatpush3.bf16.msra.mxu1 %v5210_v47  ;;  %v5244_v47 = vld [vmem:[#allocation11 + $0x3c] ss:$24 sps:$4 sm:$0xff]  }
 0x291   :  { %4518 = vmatprep.subr.bf16.mxu1 %v5211_v49  ;;  %v5242_v49 = vld [vmem:[#allocation11 + $0x38] ss:$24 sps:$4 sm:$0xff]  }
 0x294   :  { %4519 = vmatpush3.bf16.msra.mxu1 %v5212_v50  ;;  %v5247_v50 = vld [vmem:[#allocation11 + $0x6c] ss:$24 sps:$4 sm:$0xff]  }
 0x295   :  { %4520 = vmatprep.subr.bf16.mxu1 %v5213_v51  ;;  %v5245_v51 = vld [vmem:[#allocation11 + $0x68] ss:$24 sps:$4 sm:$0xff]  }
 0x298   :  { %4521 = vmatpush3.bf16.msra.mxu1 %v5214_v52  ;;  %v5250_v52 = vld [vmem:[#allocation11 + $0x9c] ss:$24 sps:$4 sm:$0xff]  }
 0x299   :  { %3820 = vmatprep.subr.bf16.mxu1 %v5217_v53  ;;  %v5248_v53 = vld [vmem:[#allocation11 + $0x98] ss:$24 sps:$4 sm:$0xff]  }
 0x32e   :  { %v4478_v54 = vpop.f32.mrb[4].mxu1 }
 0x32f   :  { %v4479_v55 = vpop.f32.mrb[5].mxu1 }
 0x330   :  { %v4480_v56 = vadd.f32 %v4479_v55, %v4478_v54  ;;  %v4481_v57 = vpop.f32.mrb[6].mxu1  ;;  %v5253_v54 = vld [vmem:[#allocation11 + $0xcc] ss:$24 sps:$4 sm:$0xff]   ;;  %v5251_v55 = vld [vmem:[#allocation11 + $0xc8] ss:$24 sps:$4 sm:$0xff]  }
 0x331   :  { %v4482_v58 = vpop.f32.mrb[7].mxu1  ;;  %v5254_v57 = vld [vmem:[#allocation11 + $0xf8] ss:$24 sps:$4 sm:$0xff]  }
 0x332   :  { %v3413_v0 = vadd.f32 %v4480_v56, %v4365_v60  ;;  %v5256_v56 = vld [vmem:[#allocation11 + $0xfc] ss:$24 sps:$4 sm:$0xff]   ;;  %v5259_v58 = vld [vmem:[#allocation11 + $0x12c] ss:$24 sps:$4 sm:$0xff]   ;;  %v5257_v60 = vld [vmem:[#allocation11 + $0x128] ss:$24 sps:$4 sm:$0xff]  }
 0x34e   :  { %v4500_v9 = vpop.f32.mrb[8].mxu1 }
 0x34f   :  { %v4501_v61 = vpop.f32.mrb[9].mxu1 }
 0x350   :  { %v4502_v1 = vadd.f32 %v4501_v61, %v4500_v9  ;;  %v4503_v2 = vpop.f32.mrb[10].mxu1  ;;  %v5262_v9 = vld [vmem:[#allocation11 + $0x15c] ss:$24 sps:$4 sm:$0xff]   ;;  %v5260_v61 = vld [vmem:[#allocation11 + $0x158] ss:$24 sps:$4 sm:$0xff]  }
 0x351   :  { %v4504_v6 = vpop.f32.mrb[11].mxu1  ;;  %v5266_v2 = vld [vmem:[#allocation11 + $0x40] ss:$24 sps:$4 sm:$0xff]  }
 0x352   :  { %v3453_v7 = vadd.f32 %v4502_v1, %v3413_v0  ;;  %v2968_v8 = vpop.f32.mrb[4].mxu0  ;;  %v5263_v0 = vld [vmem:[#allocation11 + $0x10] ss:$24 sps:$4 sm:$0xff]   ;;  %v5268_v1 = vld [vmem:[#allocation11 + $0x44] ss:$24 sps:$4 sm:$0xff]  }
 0x353   :  { %v4532_v10 = vadd.f32 %v2968_v8, %v524_v62  ;;  %v2970_v11 = vpop.f32.mrb[5].mxu0  ;;  %v5265_v62 = vld [vmem:[#allocation11 + $0x14] ss:$24 sps:$4 sm:$0xff]   ;;  %v5269_v6 = vld [vmem:[#allocation11 + $0x70] ss:$24 sps:$4 sm:$0xff]  }
 0x354   :  { %v4533_v14 = vadd.f32 %v2970_v11, %v528_v5  ;;  %v2972_v63 = vpop.f32.mrb[6].mxu0  ;;  %v5271_v5 = vld [vmem:[#allocation11 + $0x74] ss:$24 sps:$4 sm:$0xff]   ;;  %v5272_v8 = vld [vmem:[#allocation11 + $0xa0] ss:$24 sps:$4 sm:$0xff]  }
 0x355   :  { %v2979_v16 = vmax.f32 %v4532_v10, 0.0  ;;  %v2973_v18 = vpop.f32.mrb[7].mxu0  ;;  %v5277_v10 = vld [vmem:[#allocation11 + $0xd4] ss:$24 sps:$4 sm:$0xff]   ;;  %v5275_v11 = vld [vmem:[#allocation11 + $0xd0] ss:$24 sps:$4 sm:$0xff]  }
 0x356   :  { %v2980_v17 = vmax.f32 %v4533_v14, 0.0  ;;  %v5280_v14 = vld [vmem:[#allocation11 + $0x104] ss:$24 sps:$4 sm:$0xff]   ;;  %v5278_v63 = vld [vmem:[#allocation11 + $0x100] ss:$24 sps:$4 sm:$0xff]  }
 0x357   :  { %v2985_v3 = vpack.c.bf16 %v2979_v16, %v2979_v16  ;;  %v5283_v16 = vld [vmem:[#allocation11 + $0x134] ss:$24 sps:$4 sm:$0xff]   ;;  %v5281_v18 = vld [vmem:[#allocation11 + $0x130] ss:$24 sps:$4 sm:$0xff]  }
 0x358   :  { %v2986_v20 = vpack.c.bf16 %v2980_v17, %v2980_v17  ;;  %v5286_v17 = vld [vmem:[#allocation11 + $0x164] ss:$24 sps:$4 sm:$0xff]  }
 0x35a   :  { %3490 = vmatprep.mubr.bf16.mxu1 %v2986_v20  ;;  %v5284_v20 = vld [vmem:[#allocation11 + $0x160] ss:$24 sps:$4 sm:$0xff]  }
 0x35b   :  { %3491 = vmatmul.mubr.bf16.vlgmr.msra.gmra.mrb[12].mxu1 %v2985_v3 }
 0x35c   :  { %3821 = vmatpush1.bf16.msra.mxu1 %v5215_v21  ;;  %3852 = vmatprep.mubr.bf16.mxu1 %v5484_v39  ;;  %v3548_v21 = vld [vmem:[#allocation13] sm:$0x3f] }
 0x35d   :  { %3822 = vmatprep.subr.bf16.mxu1 %v5220_v22  ;;  %v3553_v3 = vrot.slane %v3548_v21, %v507_v32  ;;  %v3557_v22 = vrot.slane %v3548_v21, %v511_v19 }
 0x360   :  { %3823 = vmatpush1.bf16.msra.mxu1 %v5218_v23 }
 0x361   :  { %3824 = vmatprep.subr.bf16.mxu1 %v5223_v12 }
 0x364   :  { %3825 = vmatpush1.bf16.msra.mxu1 %v5221_v24 }
 0x365   :  { %3826 = vmatprep.subr.bf16.mxu1 %v5226_v26 }
 0x368   :  { %3827 = vmatpush1.bf16.msra.mxu1 %v5224_v27 }
 0x369   :  { %3828 = vmatprep.subr.bf16.mxu1 %v5229_v28 }
 0x36c   :  { %3829 = vmatpush1.bf16.msra.mxu1 %v5227_v30 }
 0x36d   :  { %3830 = vmatprep.subr.bf16.mxu1 %v5232_v31 }
 0x370   :  { %3831 = vmatpush1.bf16.msra.mxu1 %v5230_v13  ;;  %v3561_v13 = vrot.slane %v3548_v21, %v515_v15 }
 0x371   :  { %3832 = vmatprep.subr.bf16.mxu1 %v5235_v33  ;;  %v3565_v33 = vrot.slane %v3548_v21, %v519_v48 }
 0x374   :  { %3833 = vmatpush1.bf16.msra.mxu1 %v5233_v34 }
 0x375   :  { %3834 = vmatprep.subr.bf16.mxu1 %v5238_v36 }
 0x378   :  { %3835 = vmatpush1.bf16.msra.mxu1 %v5236_v37 }
 0x379   :  { %3861 = vmatprep.subr.bf16.mxu1 %v5241_v38 }
 0x42e   :  { %v4522_v35 = vpop.f32.mrb[12].mxu1 }
 0x42f   :  { %v4523_v40 = vpop.f32.mrb[13].mxu1 }
 0x430   :  { %v4524_v41 = vadd.f32 %v4523_v40, %v4522_v35  ;;  %v4525_v42 = vpop.f32.mrb[14].mxu1  ;;  %v3569_v40 = vrot.slane %v3548_v21, %v523_v59 }
 0x431   :  { %v4526_v43 = vpop.f32.mrb[15].mxu1 }
 0x432   :  { %v3493_v44 = vadd.f32 %v4524_v41, %v3453_v7  ;;  %v5274_v7 = vld [vmem:[#allocation11 + $0xa4] ss:$24 sps:$4 sm:$0xff]   ;;  %v3573_v41 = vrot.slane %v3548_v21, %v527_v4 }
 0x434   :  { %v3498_v45 = vmax.f32 %v3493_v44, 0.0 }
 0x436   :  { %v5702_v25 = vpack.c.bf16 %v3498_v45, %v3498_v45 }
 0x438   :  { %3853 = vmatmul.mubr.bf16.vlgmr.msra.gmra.mrb[16].mxu1 %v5702_v25 }
 0x439   :  { %3862 = vmatpush1.bf16.msra.mxu1 %v5239_v46  ;;  %3893 = vmatprep.mubr.bf16.mxu1 %v5484_v39 }
 0x43a   :  { %3863 = vmatprep.subr.bf16.mxu1 %v5244_v47 }
 0x43d   :  { %3864 = vmatpush1.bf16.msra.mxu1 %v5242_v49 }
 0x43e   :  { %3865 = vmatprep.subr.bf16.mxu1 %v5247_v50 }
 0x441   :  { %3866 = vmatpush1.bf16.msra.mxu1 %v5245_v51 }
 0x442   :  { %3867 = vmatprep.subr.bf16.mxu1 %v5250_v52 }
 0x445   :  { %3868 = vmatpush1.bf16.msra.mxu1 %v5248_v53 }
 0x446   :  { %3869 = vmatprep.subr.bf16.mxu1 %v5253_v54 }
 0x449   :  { %3870 = vmatpush1.bf16.msra.mxu1 %v5251_v55 }
 0x44a   :  { %3871 = vmatprep.subr.bf16.mxu1 %v5256_v56 }
 0x44d   :  { %3872 = vmatpush1.bf16.msra.mxu1 %v5254_v57 }
 0x44e   :  { %3873 = vmatprep.subr.bf16.mxu1 %v5259_v58 }
 0x451   :  { %3874 = vmatpush1.bf16.msra.mxu1 %v5257_v60 }
 0x452   :  { %3875 = vmatprep.subr.bf16.mxu1 %v5262_v9 }
 0x455   :  { %3876 = vmatpush1.bf16.msra.mxu1 %v5260_v61 }
 0x456   :  { %3902 = vmatprep.subr.bf16.mxu1 %v5265_v62 }
 0x458   :  { %3894 = vmatmul.mubr.bf16.vlgmr.msra.gmra.mrb[20].mxu1 %v5702_v25 }
 0x459   :  { %3903 = vmatpush1.bf16.msra.mxu1 %v5263_v0  ;;  %3934 = vmatprep.mubr.bf16.mxu1 %v5484_v39 }
 0x45a   :  { %3904 = vmatprep.subr.bf16.mxu1 %v5268_v1 }
 0x45d   :  { %3905 = vmatpush1.bf16.msra.mxu1 %v5266_v2 }
 0x45e   :  { %3906 = vmatprep.subr.bf16.mxu1 %v5271_v5 }
 0x461   :  { %3907 = vmatpush1.bf16.msra.mxu1 %v5269_v6 }
 0x462   :  { %3908 = vmatprep.subr.bf16.mxu1 %v5274_v7 }
 0x465   :  { %3909 = vmatpush1.bf16.msra.mxu1 %v5272_v8 }
 0x466   :  { %3910 = vmatprep.subr.bf16.mxu1 %v5277_v10 }
 0x469   :  { %3911 = vmatpush1.bf16.msra.mxu1 %v5275_v11 }
 0x46a   :  { %3912 = vmatprep.subr.bf16.mxu1 %v5280_v14 }
 0x46d   :  { %3913 = vmatpush1.bf16.msra.mxu1 %v5278_v63 }
 0x46e   :  { %3914 = vmatprep.subr.bf16.mxu1 %v5283_v16 }
 0x471   :  { %3915 = vmatpush1.bf16.msra.mxu1 %v5281_v18 }
 0x472   :  { %3916 = vmatprep.subr.bf16.mxu1 %v5286_v17 }
 0x475   :  { %3917 = vmatpush1.bf16.msra.mxu1 %v5284_v20 }
 0x478   :  { %3935 = vmatmul.mubr.bf16.vlgmr.msra.gmra.mrb[24].mxu1 %v5702_v25 }
 0x50b   :  { %v3854_v23 = vpop.f32.mrb[16].mxu1 }
 0x50c   :  { %v3855_v12 = vadd.f32 %v3854_v23, %v3553_v3  ;;  %v3856_v24 = vpop.f32.mrb[17].mxu1 }
 0x50d   :  { %v3857_v26 = vadd.f32 %v3856_v24, %v3557_v22  ;;  %v3858_v27 = vpop.f32.mrb[18].mxu1 }
 0x50e   :  { %v3943_v28 = vmax.f32 %v3855_v12, 0.0  ;;  %v3859_v30 = vpop.f32.mrb[19].mxu1 }
 0x50f   :  { %v3944_v31 = vmax.f32 %v3857_v26, 0.0 }
 0x510   :  { %3949 = vst [vmem:[#allocation14] sm:$0xff] %v3943_v28 }
 0x511   :  { %3950 = vst [vmem:[#allocation14 + $0x8] sm:$0xff] %v3944_v31 }
 0x52b   :  { %v3895_v32 = vpop.f32.mrb[20].mxu1 }
 0x52c   :  { %v3896_v34 = vadd.f32 %v3895_v32, %v3561_v13  ;;  %v3897_v36 = vpop.f32.mrb[21].mxu1 }
 0x52d   :  { %v3898_v19 = vadd.f32 %v3897_v36, %v3565_v33  ;;  %v3899_v37 = vpop.f32.mrb[22].mxu1 }
 0x52e   :  { %v3945_v38 = vmax.f32 %v3896_v34, 0.0  ;;  %v3900_v39 = vpop.f32.mrb[23].mxu1 }
 0x52f   :  { %v3946_v35 = vmax.f32 %v3898_v19, 0.0 }
 0x530   :  { %3951 = vst [vmem:[#allocation14 + $0x10] sm:$0xff] %v3945_v38 }
 0x531   :  { %3952 = vst [vmem:[#allocation14 + $0x18] sm:$0xff] %v3946_v35 }
 0x54b   :  { %v3936_v15 = vpop.f32.mrb[24].mxu1 }
 0x54c   :  { %v3937_v42 = vadd.f32 %v3936_v15, %v3569_v40  ;;  %v3938_v43 = vpop.f32.mrb[25].mxu1 }
 0x54d   :  { %v3939_v48 = vadd.f32 %v3938_v43, %v3573_v41  ;;  %v3940_v44 = vpop.f32.mrb[26].mxu1 }
 0x54e   :  { %v3947_v45 = vmax.f32 %v3937_v42, 0.0  ;;  %v3941_v46 = vpop.f32.mrb[27].mxu1 }
 0x54f   :  { %v3948_v25 = vmax.f32 %v3939_v48, 0.0 }
 0x550   :  { %3953 = vst [vmem:[#allocation14 + $0x20] sm:$0xff] %v3947_v45 }
 0x551   :  { %3954 = vst [vmem:[#allocation14 + $0x28] sm:$0xff] %v3948_v25 }
 0x552   :  { %5452 = shalt.err (!%p5449_p4)
}
 0x553   :  { %s5453_s8 = scalar_lea.hbm %s5738_s7, 768 }
 0x554   :  { %p5454_p5 = scmp.ne.s32.totalorder %s5738_s7, %s5453_s8  ;;  %p5457_p6 = scmp.lt.u32.totalorder %s5453_s8, %s5738_s7 }
 0x556   :  { %p5459_p7 = pnand %p5457_p6, %p5454_p5 }
 0x558   :  { %5462 = shalt.err (!%p5459_p7)
}
 0x559   :  { %3964 = dma.vmem_to_hbm [thread:$0]  %s3962_s14, 768, %s5738_s7, [#allocation4]  }
 0x55a   :  { %5471 = dma.done.wait [#allocation4], 768  }
 0x55b   :  { %5472 = vsyncadd [#allocation4], 4294966528 }
 0x55c   :  { %3968 = vsyncpa [#allocation3], 1 }
 0x55d   :  { %3969 = vsyncpa [#allocation6], 1 }
 0x55e   :  { %3970 = vsyncpa [#allocation9], 1 }
 0x55f   :  { %3971 = vsyncpa [#allocation12], 1 }
 0x560   :  { %3972 = vsyncpa [#allocation4], 1 }

</bundles_post_ra>
